<compile_context>
chip_gen: v7x
topology: tpu7x:2x2x1
jax: 0.10.0
libtpu: 0.0.40
codegen_flags: <defaults>
</compile_context>

<pallas_src>
import functools

import jax
import jax.numpy as jnp
from jax import lax
from jax.experimental import pallas as pl
from jax.experimental.pallas import tpu as pltpu

IN_DIM = 2
HID = 5
OUT_DIM = 1
STRIP = 512  # lanes per inner strip: 4 f32 vregs of (8,128)

# Packed parameter vector length: (2*5+5) + 4*(5*5+5) + (5*1+1) = 141
PACKED_LEN = (IN_DIM * HID + HID) + 4 * (HID * HID + HID) + (HID * OUT_DIM + OUT_DIM)


def _mlp_kernel(p_ref, x_ref, t_ref, out_ref, *, compute_dtype):
    """p_ref: (PACKED_LEN,) f32 in SMEM (affine-folded params, see pack_params).

    x/t/out refs: (block_r, lane_w) f32 tiles in VMEM.  The block is processed
    as lane_w // STRIP independent (block_r, STRIP) strips inside a fori_loop
    so per-strip live vregs stay low while per-grid-step work is large.
    """
    lane_w = x_ref.shape[1]
    n_strips = lane_w // STRIP  # static Python int

    def param(i):  # scalar read from SMEM (cheap sld; re-read per strip on purpose)
        return p_ref[i].astype(compute_dtype)

    def strip_body(s, carry):
        start = pl.multiple_of(s * STRIP, STRIP)
        sl = pl.ds(start, STRIP)

        # ----- layer 1: 2 -> 5, tanh (x/t are dead after this loop) -----
        inputs = (x_ref[:, sl].astype(compute_dtype),
                  t_ref[:, sl].astype(compute_dtype))
        off = 0
        w_off, b_off = off, off + HID * IN_DIM
        h = []
        for j in range(HID):
            z = param(b_off + j)
            for k in range(IN_DIM):
                z = z + param(w_off + j * IN_DIM + k) * inputs[k]
            h.append(jnp.tanh(z))
        off = b_off + HID

        # ----- layers 2..5: 5 -> 5, tanh -----
        for _ in range(4):
            w_off, b_off = off, off + HID * HID
            new_h = []
            for j in range(HID):
                z = param(b_off + j)
                for k in range(HID):
                    z = z + param(w_off + j * HID + k) * h[k]
                new_h.append(jnp.tanh(z))
            h = new_h
            off = b_off + HID

        # ----- output layer: 5 -> 1, no activation -----
        w_off, b_off = off, off + HID * OUT_DIM
        z = param(b_off)
        for k in range(HID):
            z = z + param(w_off + k) * h[k]

        out_ref[:, sl] = z.astype(out_ref.dtype)
        return carry

    lax.fori_loop(0, n_strips, strip_body, 0)


def pack_params(params):
    """Pack the 6 (W, b) pairs into one 1-D f32 vector with the sigmoid affine
    folded in, so the kernel computes:

        t_1 = tanh(A_1 @ [x;t] + c_1)
        t_L = tanh(A_L @ t_{L-1} + c_L)     L = 2..5
        out = A_6 @ t_5 + c_6

    which is exactly equal to the original sigmoid MLP, using
    sigmoid(z) = 0.5 + 0.5*tanh(0.5*z):
        A_1 = 0.5*W_1,  c_1 = 0.5*b_1
        A_L = 0.25*W_L, c_L = 0.5*b_L + 0.25*rowsum(W_L)   (L = 2..5)
        A_6 = 0.5*W_6,  c_6 = b_6 + 0.5*rowsum(W_6)

    Weights are stored here as (in, out) = torch-W^T; they are flattened in
    torch (out, in) row-major order to match the kernel's indexing.
    """
    n_layers = len(params)
    pieces = []
    for i, (w, b) in enumerate(params):           # w: (in, out), b: (1, out)
        w = w.astype(jnp.float32)
        b = b.reshape(-1).astype(jnp.float32)
        if i == 0:
            a = 0.5 * w
            c = 0.5 * b
        elif i < n_layers - 1:
            a = 0.25 * w
            c = 0.5 * b + 0.25 * jnp.sum(w, axis=0)   # rowsum over inputs
        else:
            a = 0.5 * w
            c = b + 0.5 * jnp.sum(w, axis=0)
        pieces.append(a.T.reshape(-1))            # (out, in) row-major
        pieces.append(c.reshape(-1))
    packed = jnp.concatenate(pieces)
    assert packed.shape == (PACKED_LEN,)
    return packed


@functools.partial(jax.jit, static_argnames=("block_r", "lane_w", "compute_dtype"))
def net_forward(x, t, packed_params, *, block_r=8, lane_w=8192,
                compute_dtype=jnp.float32):
    """Forward pass of Net.  x, t: (N, 1) float32 -> (N, 1) float32.

    compute_dtype=jnp.bfloat16 enables the faster activation path on v6e/v7x
    (relax the comparison tolerance to ~1e-2 if used); keep f32 on v5e.
    """
    assert block_r % 8 == 0 and lane_w % STRIP == 0
    n = x.shape[0]
    tile = block_r * lane_w
    n_pad = pl.cdiv(n, tile) * tile

    xf = x.reshape(-1)
    tf = t.reshape(-1)
    if n_pad != n:                       # skip the pad copy for aligned batches
        xf = jnp.pad(xf, (0, n_pad - n))
        tf = jnp.pad(tf, (0, n_pad - n))
    rows = n_pad // lane_w
    x2 = xf.reshape(rows, lane_w)
    t2 = tf.reshape(rows, lane_w)

    data_spec = pl.BlockSpec((block_r, lane_w), lambda i: (i, 0))
    kernel = functools.partial(_mlp_kernel, compute_dtype=compute_dtype)

    out2 = pl.pallas_call(
        kernel,
        out_shape=jax.ShapeDtypeStruct((rows, lane_w), jnp.float32),
        grid=(rows // block_r,),
        in_specs=[
            pl.BlockSpec(memory_space=pltpu.MemorySpace.SMEM),  # packed params
            data_spec,   # x tile
            data_spec,   # t tile
        ],
        out_specs=data_spec,
        compiler_params=pltpu.CompilerParams(
            dimension_semantics=("parallel",)),
    )(packed_params, x2, t2)

    out_flat = out2.reshape(n_pad)
    if n_pad != n:
        out_flat = out_flat[:n]
    return out_flat.reshape(n, 1)


def init_params(key):
    """PyTorch-style init: U(-1/sqrt(fan_in), +1/sqrt(fan_in)).

    Weights stored as (in_features, out_features) = W^T relative to torch;
    biases as (1, out_features).
    """
    layer_dims = [(IN_DIM, HID), (HID, HID), (HID, HID),
                  (HID, HID), (HID, HID), (HID, OUT_DIM)]
    params = []
    for (fan_in, fan_out) in layer_dims:
        key, kw, kb = jax.random.split(key, 3)
        bound = 1.0 / jnp.sqrt(fan_in)
        w = jax.random.uniform(kw, (fan_in, fan_out), jnp.float32, -bound, bound)
        b = jax.random.uniform(kb, (1, fan_out), jnp.float32, -bound, bound)
        params.append((w, b))
    return params


def net_forward_ref(x, t, params):
    """Pure-JAX reference (raw torch-equivalent weights + sigmoid)."""
    h = jnp.concatenate([x, t], axis=1)
    for i, (w, b) in enumerate(params):
        h = h @ w + b
        if i < len(params) - 1:
            h = jax.nn.sigmoid(h)
    return h


if __name__ == "__main__":
    key = jax.random.PRNGKey(0)
    kp, kx, kt = jax.random.split(key, 3)

    params = init_params(kp)
    packed = pack_params(params)

    # Small ragged batch of (x, t) collocation points (exercises tail padding).
    N = 100
    x = jax.random.uniform(kx, (N, 1), jnp.float32)
    t = jax.random.uniform(kt, (N, 1), jnp.float32)
    out = jax.block_until_ready(net_forward(x, t, packed))
    ref = net_forward_ref(x, t, params)
    assert out.shape == (N, 1)
    assert jnp.allclose(out, ref, atol=2e-5, rtol=1e-5), "mismatch (ragged batch)"

    # Tile-aligned batch with a multi-step grid (exercises the no-pad fast path
    # and the grid loop at a smaller lane_w).
    N2 = 2 * 8 * 1024
    kx2, kt2 = jax.random.split(kt)
    x2 = jax.random.uniform(kx2, (N2, 1), jnp.float32)
    t2 = jax.random.uniform(kt2, (N2, 1), jnp.float32)
    out2 = jax.block_until_ready(net_forward(x2, t2, packed, block_r=8, lane_w=1024))
    ref2 = net_forward_ref(x2, t2, params)
    assert out2.shape == (N2, 1)
    assert jnp.allclose(out2, ref2, atol=2e-5, rtol=1e-5), "mismatch (aligned batch)"

    print("KERNEL_OK")
</pallas_src>

<mosaic_0001>
module attributes {stable_mosaic.version = 11 : i64} {
  func.func @_mlp_kernel(%arg0: i32, %arg1: memref<141xf32, #tpu.memory_space<smem>>, %arg2: memref<8x8192xf32, #tpu.memory_space<vmem>>, %arg3: memref<8x8192xf32, #tpu.memory_space<vmem>>, %arg4: memref<8x8192xf32, #tpu.memory_space<vmem>>) attributes {dimension_semantics = [#tpu.dimension_semantics<parallel>], iteration_bounds = array<i64: 1>, scalar_prefetch = 0 : i64, scratch_operands = 0 : i64, tpu.core_type = #tpu.core_type<tc>, window_params = [{transform_indices = @transform_0, window_bounds = array<i64: 141>}, {transform_indices = @transform_1, window_bounds = array<i64: 8, 8192>}, {transform_indices = @transform_2, window_bounds = array<i64: 8, 8192>}, {transform_indices = @transform_3, window_bounds = array<i64: 8, 8192>}]} {
    %c0_i32 = arith.constant 0 : i32
    %c16_i32 = arith.constant 16 : i32
    %0 = arith.addi %c0_i32, %c16_i32 : i32
    %c1_i32 = arith.constant 1 : i32
    scf.for %arg5 = %c0_i32 to %0 step %c1_i32  : i32 {
      %c512_i32 = arith.constant 512 : i32
      %1 = arith.muli %arg5, %c512_i32 : i32
      %2 = tpu.assume_multiple %1, 512 : i32
      %c0 = arith.constant 0 : index
      %3 = arith.index_cast %2 : i32 to index
      %4 = vector.load %arg2[%c0, %3] : memref<8x8192xf32, #tpu.memory_space<vmem>>, vector<8x512xf32>
      %c0_1 = arith.constant 0 : index
      %5 = arith.index_cast %2 : i32 to index
      %6 = vector.load %arg3[%c0_1, %5] : memref<8x8192xf32, #tpu.memory_space<vmem>>, vector<8x512xf32>
      %c10 = arith.constant 10 : index
      %7 = memref.load %arg1[%c10] : memref<141xf32, #tpu.memory_space<smem>>
      %c0_2 = arith.constant 0 : index
      %8 = memref.load %arg1[%c0_2] : memref<141xf32, #tpu.memory_space<smem>>
      %9 = vector.broadcast %8 : f32 to vector<8x512xf32>
      %10 = arith.mulf %9, %4 : vector<8x512xf32>
      %11 = vector.broadcast %7 : f32 to vector<8x512xf32>
      %12 = arith.addf %11, %10 : vector<8x512xf32>
      %c1 = arith.constant 1 : index
      %13 = memref.load %arg1[%c1] : memref<141xf32, #tpu.memory_space<smem>>
      %14 = vector.broadcast %13 : f32 to vector<8x512xf32>
      %15 = arith.mulf %14, %6 : vector<8x512xf32>
      %16 = arith.addf %12, %15 : vector<8x512xf32>
      %17 = math.tanh %16 : vector<8x512xf32>
      %c11 = arith.constant 11 : index
      %18 = memref.load %arg1[%c11] : memref<141xf32, #tpu.memory_space<smem>>
      %c2 = arith.constant 2 : index
      %19 = memref.load %arg1[%c2] : memref<141xf32, #tpu.memory_space<smem>>
      %20 = vector.broadcast %19 : f32 to vector<8x512xf32>
      %21 = arith.mulf %20, %4 : vector<8x512xf32>
      %22 = vector.broadcast %18 : f32 to vector<8x512xf32>
      %23 = arith.addf %22, %21 : vector<8x512xf32>
      %c3 = arith.constant 3 : index
      %24 = memref.load %arg1[%c3] : memref<141xf32, #tpu.memory_space<smem>>
      %25 = vector.broadcast %24 : f32 to vector<8x512xf32>
      %26 = arith.mulf %25, %6 : vector<8x512xf32>
      %27 = arith.addf %23, %26 : vector<8x512xf32>
      %28 = math.tanh %27 : vector<8x512xf32>
      %c12 = arith.constant 12 : index
      %29 = memref.load %arg1[%c12] : memref<141xf32, #tpu.memory_space<smem>>
      %c4 = arith.constant 4 : index
      %30 = memref.load %arg1[%c4] : memref<141xf32, #tpu.memory_space<smem>>
      %31 = vector.broadcast %30 : f32 to vector<8x512xf32>
      %32 = arith.mulf %31, %4 : vector<8x512xf32>
      %33 = vector.broadcast %29 : f32 to vector<8x512xf32>
      %34 = arith.addf %33, %32 : vector<8x512xf32>
      %c5 = arith.constant 5 : index
      %35 = memref.load %arg1[%c5] : memref<141xf32, #tpu.memory_space<smem>>
      %36 = vector.broadcast %35 : f32 to vector<8x512xf32>
      %37 = arith.mulf %36, %6 : vector<8x512xf32>
      %38 = arith.addf %34, %37 : vector<8x512xf32>
      %39 = math.tanh %38 : vector<8x512xf32>
      %c13 = arith.constant 13 : index
      %40 = memref.load %arg1[%c13] : memref<141xf32, #tpu.memory_space<smem>>
      %c6 = arith.constant 6 : index
      %41 = memref.load %arg1[%c6] : memref<141xf32, #tpu.memory_space<smem>>
      %42 = vector.broadcast %41 : f32 to vector<8x512xf32>
      %43 = arith.mulf %42, %4 : vector<8x512xf32>
      %44 = vector.broadcast %40 : f32 to vector<8x512xf32>
      %45 = arith.addf %44, %43 : vector<8x512xf32>
      %c7 = arith.constant 7 : index
      %46 = memref.load %arg1[%c7] : memref<141xf32, #tpu.memory_space<smem>>
      %47 = vector.broadcast %46 : f32 to vector<8x512xf32>
      %48 = arith.mulf %47, %6 : vector<8x512xf32>
      %49 = arith.addf %45, %48 : vector<8x512xf32>
      %50 = math.tanh %49 : vector<8x512xf32>
      %c14 = arith.constant 14 : index
      %51 = memref.load %arg1[%c14] : memref<141xf32, #tpu.memory_space<smem>>
      %c8 = arith.constant 8 : index
      %52 = memref.load %arg1[%c8] : memref<141xf32, #tpu.memory_space<smem>>
      %53 = vector.broadcast %52 : f32 to vector<8x512xf32>
      %54 = arith.mulf %53, %4 : vector<8x512xf32>
      %55 = vector.broadcast %51 : f32 to vector<8x512xf32>
      %56 = arith.addf %55, %54 : vector<8x512xf32>
      %c9 = arith.constant 9 : index
      %57 = memref.load %arg1[%c9] : memref<141xf32, #tpu.memory_space<smem>>
      %58 = vector.broadcast %57 : f32 to vector<8x512xf32>
      %59 = arith.mulf %58, %6 : vector<8x512xf32>
      %60 = arith.addf %56, %59 : vector<8x512xf32>
      %61 = math.tanh %60 : vector<8x512xf32>
      %c40 = arith.constant 40 : index
      %62 = memref.load %arg1[%c40] : memref<141xf32, #tpu.memory_space<smem>>
      %c15 = arith.constant 15 : index
      %63 = memref.load %arg1[%c15] : memref<141xf32, #tpu.memory_space<smem>>
      %64 = vector.broadcast %63 : f32 to vector<8x512xf32>
      %65 = arith.mulf %64, %17 : vector<8x512xf32>
      %66 = vector.broadcast %62 : f32 to vector<8x512xf32>
      %67 = arith.addf %66, %65 : vector<8x512xf32>
      %c16 = arith.constant 16 : index
      %68 = memref.load %arg1[%c16] : memref<141xf32, #tpu.memory_space<smem>>
      %69 = vector.broadcast %68 : f32 to vector<8x512xf32>
      %70 = arith.mulf %69, %28 : vector<8x512xf32>
      %71 = arith.addf %67, %70 : vector<8x512xf32>
      %c17 = arith.constant 17 : index
      %72 = memref.load %arg1[%c17] : memref<141xf32, #tpu.memory_space<smem>>
      %73 = vector.broadcast %72 : f32 to vector<8x512xf32>
      %74 = arith.mulf %73, %39 : vector<8x512xf32>
      %75 = arith.addf %71, %74 : vector<8x512xf32>
      %c18 = arith.constant 18 : index
      %76 = memref.load %arg1[%c18] : memref<141xf32, #tpu.memory_space<smem>>
      %77 = vector.broadcast %76 : f32 to vector<8x512xf32>
      %78 = arith.mulf %77, %50 : vector<8x512xf32>
      %79 = arith.addf %75, %78 : vector<8x512xf32>
      %c19 = arith.constant 19 : index
      %80 = memref.load %arg1[%c19] : memref<141xf32, #tpu.memory_space<smem>>
      %81 = vector.broadcast %80 : f32 to vector<8x512xf32>
      %82 = arith.mulf %81, %61 : vector<8x512xf32>
      %83 = arith.addf %79, %82 : vector<8x512xf32>
      %84 = math.tanh %83 : vector<8x512xf32>
      %c41 = arith.constant 41 : index
      %85 = memref.load %arg1[%c41] : memref<141xf32, #tpu.memory_space<smem>>
      %c20 = arith.constant 20 : index
      %86 = memref.load %arg1[%c20] : memref<141xf32, #tpu.memory_space<smem>>
      %87 = vector.broadcast %86 : f32 to vector<8x512xf32>
      %88 = arith.mulf %87, %17 : vector<8x512xf32>
      %89 = vector.broadcast %85 : f32 to vector<8x512xf32>
      %90 = arith.addf %89, %88 : vector<8x512xf32>
      %c21 = arith.constant 21 : index
      %91 = memref.load %arg1[%c21] : memref<141xf32, #tpu.memory_space<smem>>
      %92 = vector.broadcast %91 : f32 to vector<8x512xf32>
      %93 = arith.mulf %92, %28 : vector<8x512xf32>
      %94 = arith.addf %90, %93 : vector<8x512xf32>
      %c22 = arith.constant 22 : index
      %95 = memref.load %arg1[%c22] : memref<141xf32, #tpu.memory_space<smem>>
      %96 = vector.broadcast %95 : f32 to vector<8x512xf32>
      %97 = arith.mulf %96, %39 : vector<8x512xf32>
      %98 = arith.addf %94, %97 : vector<8x512xf32>
      %c23 = arith.constant 23 : index
      %99 = memref.load %arg1[%c23] : memref<141xf32, #tpu.memory_space<smem>>
      %100 = vector.broadcast %99 : f32 to vector<8x512xf32>
      %101 = arith.mulf %100, %50 : vector<8x512xf32>
      %102 = arith.addf %98, %101 : vector<8x512xf32>
      %c24 = arith.constant 24 : index
      %103 = memref.load %arg1[%c24] : memref<141xf32, #tpu.memory_space<smem>>
      %104 = vector.broadcast %103 : f32 to vector<8x512xf32>
      %105 = arith.mulf %104, %61 : vector<8x512xf32>
      %106 = arith.addf %102, %105 : vector<8x512xf32>
      %107 = math.tanh %106 : vector<8x512xf32>
      %c42 = arith.constant 42 : index
      %108 = memref.load %arg1[%c42] : memref<141xf32, #tpu.memory_space<smem>>
      %c25 = arith.constant 25 : index
      %109 = memref.load %arg1[%c25] : memref<141xf32, #tpu.memory_space<smem>>
      %110 = vector.broadcast %109 : f32 to vector<8x512xf32>
      %111 = arith.mulf %110, %17 : vector<8x512xf32>
      %112 = vector.broadcast %108 : f32 to vector<8x512xf32>
      %113 = arith.addf %112, %111 : vector<8x512xf32>
      %c26 = arith.constant 26 : index
      %114 = memref.load %arg1[%c26] : memref<141xf32, #tpu.memory_space<smem>>
      %115 = vector.broadcast %114 : f32 to vector<8x512xf32>
      %116 = arith.mulf %115, %28 : vector<8x512xf32>
      %117 = arith.addf %113, %116 : vector<8x512xf32>
      %c27 = arith.constant 27 : index
      %118 = memref.load %arg1[%c27] : memref<141xf32, #tpu.memory_space<smem>>
      %119 = vector.broadcast %118 : f32 to vector<8x512xf32>
      %120 = arith.mulf %119, %39 : vector<8x512xf32>
      %121 = arith.addf %117, %120 : vector<8x512xf32>
      %c28 = arith.constant 28 : index
      %122 = memref.load %arg1[%c28] : memref<141xf32, #tpu.memory_space<smem>>
      %123 = vector.broadcast %122 : f32 to vector<8x512xf32>
      %124 = arith.mulf %123, %50 : vector<8x512xf32>
      %125 = arith.addf %121, %124 : vector<8x512xf32>
      %c29 = arith.constant 29 : index
      %126 = memref.load %arg1[%c29] : memref<141xf32, #tpu.memory_space<smem>>
      %127 = vector.broadcast %126 : f32 to vector<8x512xf32>
      %128 = arith.mulf %127, %61 : vector<8x512xf32>
      %129 = arith.addf %125, %128 : vector<8x512xf32>
      %130 = math.tanh %129 : vector<8x512xf32>
      %c43 = arith.constant 43 : index
      %131 = memref.load %arg1[%c43] : memref<141xf32, #tpu.memory_space<smem>>
      %c30 = arith.constant 30 : index
      %132 = memref.load %arg1[%c30] : memref<141xf32, #tpu.memory_space<smem>>
      %133 = vector.broadcast %132 : f32 to vector<8x512xf32>
      %134 = arith.mulf %133, %17 : vector<8x512xf32>
      %135 = vector.broadcast %131 : f32 to vector<8x512xf32>
      %136 = arith.addf %135, %134 : vector<8x512xf32>
      %c31 = arith.constant 31 : index
      %137 = memref.load %arg1[%c31] : memref<141xf32, #tpu.memory_space<smem>>
      %138 = vector.broadcast %137 : f32 to vector<8x512xf32>
      %139 = arith.mulf %138, %28 : vector<8x512xf32>
      %140 = arith.addf %136, %139 : vector<8x512xf32>
      %c32 = arith.constant 32 : index
      %141 = memref.load %arg1[%c32] : memref<141xf32, #tpu.memory_space<smem>>
      %142 = vector.broadcast %141 : f32 to vector<8x512xf32>
      %143 = arith.mulf %142, %39 : vector<8x512xf32>
      %144 = arith.addf %140, %143 : vector<8x512xf32>
      %c33 = arith.constant 33 : index
      %145 = memref.load %arg1[%c33] : memref<141xf32, #tpu.memory_space<smem>>
      %146 = vector.broadcast %145 : f32 to vector<8x512xf32>
      %147 = arith.mulf %146, %50 : vector<8x512xf32>
      %148 = arith.addf %144, %147 : vector<8x512xf32>
      %c34 = arith.constant 34 : index
      %149 = memref.load %arg1[%c34] : memref<141xf32, #tpu.memory_space<smem>>
      %150 = vector.broadcast %149 : f32 to vector<8x512xf32>
      %151 = arith.mulf %150, %61 : vector<8x512xf32>
      %152 = arith.addf %148, %151 : vector<8x512xf32>
      %153 = math.tanh %152 : vector<8x512xf32>
      %c44 = arith.constant 44 : index
      %154 = memref.load %arg1[%c44] : memref<141xf32, #tpu.memory_space<smem>>
      %c35 = arith.constant 35 : index
      %155 = memref.load %arg1[%c35] : memref<141xf32, #tpu.memory_space<smem>>
      %156 = vector.broadcast %155 : f32 to vector<8x512xf32>
      %157 = arith.mulf %156, %17 : vector<8x512xf32>
      %158 = vector.broadcast %154 : f32 to vector<8x512xf32>
      %159 = arith.addf %158, %157 : vector<8x512xf32>
      %c36 = arith.constant 36 : index
      %160 = memref.load %arg1[%c36] : memref<141xf32, #tpu.memory_space<smem>>
      %161 = vector.broadcast %160 : f32 to vector<8x512xf32>
      %162 = arith.mulf %161, %28 : vector<8x512xf32>
      %163 = arith.addf %159, %162 : vector<8x512xf32>
      %c37 = arith.constant 37 : index
      %164 = memref.load %arg1[%c37] : memref<141xf32, #tpu.memory_space<smem>>
      %165 = vector.broadcast %164 : f32 to vector<8x512xf32>
      %166 = arith.mulf %165, %39 : vector<8x512xf32>
      %167 = arith.addf %163, %166 : vector<8x512xf32>
      %c38 = arith.constant 38 : index
      %168 = memref.load %arg1[%c38] : memref<141xf32, #tpu.memory_space<smem>>
      %169 = vector.broadcast %168 : f32 to vector<8x512xf32>
      %170 = arith.mulf %169, %50 : vector<8x512xf32>
      %171 = arith.addf %167, %170 : vector<8x512xf32>
      %c39 = arith.constant 39 : index
      %172 = memref.load %arg1[%c39] : memref<141xf32, #tpu.memory_space<smem>>
      %173 = vector.broadcast %172 : f32 to vector<8x512xf32>
      %174 = arith.mulf %173, %61 : vector<8x512xf32>
      %175 = arith.addf %171, %174 : vector<8x512xf32>
      %176 = math.tanh %175 : vector<8x512xf32>
      %c70 = arith.constant 70 : index
      %177 = memref.load %arg1[%c70] : memref<141xf32, #tpu.memory_space<smem>>
      %c45 = arith.constant 45 : index
      %178 = memref.load %arg1[%c45] : memref<141xf32, #tpu.memory_space<smem>>
      %179 = vector.broadcast %178 : f32 to vector<8x512xf32>
      %180 = arith.mulf %179, %84 : vector<8x512xf32>
      %181 = vector.broadcast %177 : f32 to vector<8x512xf32>
      %182 = arith.addf %181, %180 : vector<8x512xf32>
      %c46 = arith.constant 46 : index
      %183 = memref.load %arg1[%c46] : memref<141xf32, #tpu.memory_space<smem>>
      %184 = vector.broadcast %183 : f32 to vector<8x512xf32>
      %185 = arith.mulf %184, %107 : vector<8x512xf32>
      %186 = arith.addf %182, %185 : vector<8x512xf32>
      %c47 = arith.constant 47 : index
      %187 = memref.load %arg1[%c47] : memref<141xf32, #tpu.memory_space<smem>>
      %188 = vector.broadcast %187 : f32 to vector<8x512xf32>
      %189 = arith.mulf %188, %130 : vector<8x512xf32>
      %190 = arith.addf %186, %189 : vector<8x512xf32>
      %c48 = arith.constant 48 : index
      %191 = memref.load %arg1[%c48] : memref<141xf32, #tpu.memory_space<smem>>
      %192 = vector.broadcast %191 : f32 to vector<8x512xf32>
      %193 = arith.mulf %192, %153 : vector<8x512xf32>
      %194 = arith.addf %190, %193 : vector<8x512xf32>
      %c49 = arith.constant 49 : index
      %195 = memref.load %arg1[%c49] : memref<141xf32, #tpu.memory_space<smem>>
      %196 = vector.broadcast %195 : f32 to vector<8x512xf32>
      %197 = arith.mulf %196, %176 : vector<8x512xf32>
      %198 = arith.addf %194, %197 : vector<8x512xf32>
      %199 = math.tanh %198 : vector<8x512xf32>
      %c71 = arith.constant 71 : index
      %200 = memref.load %arg1[%c71] : memref<141xf32, #tpu.memory_space<smem>>
      %c50 = arith.constant 50 : index
      %201 = memref.load %arg1[%c50] : memref<141xf32, #tpu.memory_space<smem>>
      %202 = vector.broadcast %201 : f32 to vector<8x512xf32>
      %203 = arith.mulf %202, %84 : vector<8x512xf32>
      %204 = vector.broadcast %200 : f32 to vector<8x512xf32>
      %205 = arith.addf %204, %203 : vector<8x512xf32>
      %c51 = arith.constant 51 : index
      %206 = memref.load %arg1[%c51] : memref<141xf32, #tpu.memory_space<smem>>
      %207 = vector.broadcast %206 : f32 to vector<8x512xf32>
      %208 = arith.mulf %207, %107 : vector<8x512xf32>
      %209 = arith.addf %205, %208 : vector<8x512xf32>
      %c52 = arith.constant 52 : index
      %210 = memref.load %arg1[%c52] : memref<141xf32, #tpu.memory_space<smem>>
      %211 = vector.broadcast %210 : f32 to vector<8x512xf32>
      %212 = arith.mulf %211, %130 : vector<8x512xf32>
      %213 = arith.addf %209, %212 : vector<8x512xf32>
      %c53 = arith.constant 53 : index
      %214 = memref.load %arg1[%c53] : memref<141xf32, #tpu.memory_space<smem>>
      %215 = vector.broadcast %214 : f32 to vector<8x512xf32>
      %216 = arith.mulf %215, %153 : vector<8x512xf32>
      %217 = arith.addf %213, %216 : vector<8x512xf32>
      %c54 = arith.constant 54 : index
      %218 = memref.load %arg1[%c54] : memref<141xf32, #tpu.memory_space<smem>>
      %219 = vector.broadcast %218 : f32 to vector<8x512xf32>
      %220 = arith.mulf %219, %176 : vector<8x512xf32>
      %221 = arith.addf %217, %220 : vector<8x512xf32>
      %222 = math.tanh %221 : vector<8x512xf32>
      %c72 = arith.constant 72 : index
      %223 = memref.load %arg1[%c72] : memref<141xf32, #tpu.memory_space<smem>>
      %c55 = arith.constant 55 : index
      %224 = memref.load %arg1[%c55] : memref<141xf32, #tpu.memory_space<smem>>
      %225 = vector.broadcast %224 : f32 to vector<8x512xf32>
      %226 = arith.mulf %225, %84 : vector<8x512xf32>
      %227 = vector.broadcast %223 : f32 to vector<8x512xf32>
      %228 = arith.addf %227, %226 : vector<8x512xf32>
      %c56 = arith.constant 56 : index
      %229 = memref.load %arg1[%c56] : memref<141xf32, #tpu.memory_space<smem>>
      %230 = vector.broadcast %229 : f32 to vector<8x512xf32>
      %231 = arith.mulf %230, %107 : vector<8x512xf32>
      %232 = arith.addf %228, %231 : vector<8x512xf32>
      %c57 = arith.constant 57 : index
      %233 = memref.load %arg1[%c57] : memref<141xf32, #tpu.memory_space<smem>>
      %234 = vector.broadcast %233 : f32 to vector<8x512xf32>
      %235 = arith.mulf %234, %130 : vector<8x512xf32>
      %236 = arith.addf %232, %235 : vector<8x512xf32>
      %c58 = arith.constant 58 : index
      %237 = memref.load %arg1[%c58] : memref<141xf32, #tpu.memory_space<smem>>
      %238 = vector.broadcast %237 : f32 to vector<8x512xf32>
      %239 = arith.mulf %238, %153 : vector<8x512xf32>
      %240 = arith.addf %236, %239 : vector<8x512xf32>
      %c59 = arith.constant 59 : index
      %241 = memref.load %arg1[%c59] : memref<141xf32, #tpu.memory_space<smem>>
      %242 = vector.broadcast %241 : f32 to vector<8x512xf32>
      %243 = arith.mulf %242, %176 : vector<8x512xf32>
      %244 = arith.addf %240, %243 : vector<8x512xf32>
      %245 = math.tanh %244 : vector<8x512xf32>
      %c73 = arith.constant 73 : index
      %246 = memref.load %arg1[%c73] : memref<141xf32, #tpu.memory_space<smem>>
      %c60 = arith.constant 60 : index
      %247 = memref.load %arg1[%c60] : memref<141xf32, #tpu.memory_space<smem>>
      %248 = vector.broadcast %247 : f32 to vector<8x512xf32>
      %249 = arith.mulf %248, %84 : vector<8x512xf32>
      %250 = vector.broadcast %246 : f32 to vector<8x512xf32>
      %251 = arith.addf %250, %249 : vector<8x512xf32>
      %c61 = arith.constant 61 : index
      %252 = memref.load %arg1[%c61] : memref<141xf32, #tpu.memory_space<smem>>
      %253 = vector.broadcast %252 : f32 to vector<8x512xf32>
      %254 = arith.mulf %253, %107 : vector<8x512xf32>
      %255 = arith.addf %251, %254 : vector<8x512xf32>
      %c62 = arith.constant 62 : index
      %256 = memref.load %arg1[%c62] : memref<141xf32, #tpu.memory_space<smem>>
      %257 = vector.broadcast %256 : f32 to vector<8x512xf32>
      %258 = arith.mulf %257, %130 : vector<8x512xf32>
      %259 = arith.addf %255, %258 : vector<8x512xf32>
      %c63 = arith.constant 63 : index
      %260 = memref.load %arg1[%c63] : memref<141xf32, #tpu.memory_space<smem>>
      %261 = vector.broadcast %260 : f32 to vector<8x512xf32>
      %262 = arith.mulf %261, %153 : vector<8x512xf32>
      %263 = arith.addf %259, %262 : vector<8x512xf32>
      %c64 = arith.constant 64 : index
      %264 = memref.load %arg1[%c64] : memref<141xf32, #tpu.memory_space<smem>>
      %265 = vector.broadcast %264 : f32 to vector<8x512xf32>
      %266 = arith.mulf %265, %176 : vector<8x512xf32>
      %267 = arith.addf %263, %266 : vector<8x512xf32>
      %268 = math.tanh %267 : vector<8x512xf32>
      %c74 = arith.constant 74 : index
      %269 = memref.load %arg1[%c74] : memref<141xf32, #tpu.memory_space<smem>>
      %c65 = arith.constant 65 : index
      %270 = memref.load %arg1[%c65] : memref<141xf32, #tpu.memory_space<smem>>
      %271 = vector.broadcast %270 : f32 to vector<8x512xf32>
      %272 = arith.mulf %271, %84 : vector<8x512xf32>
      %273 = vector.broadcast %269 : f32 to vector<8x512xf32>
      %274 = arith.addf %273, %272 : vector<8x512xf32>
      %c66 = arith.constant 66 : index
      %275 = memref.load %arg1[%c66] : memref<141xf32, #tpu.memory_space<smem>>
      %276 = vector.broadcast %275 : f32 to vector<8x512xf32>
      %277 = arith.mulf %276, %107 : vector<8x512xf32>
      %278 = arith.addf %274, %277 : vector<8x512xf32>
      %c67 = arith.constant 67 : index
      %279 = memref.load %arg1[%c67] : memref<141xf32, #tpu.memory_space<smem>>
      %280 = vector.broadcast %279 : f32 to vector<8x512xf32>
      %281 = arith.mulf %280, %130 : vector<8x512xf32>
      %282 = arith.addf %278, %281 : vector<8x512xf32>
      %c68 = arith.constant 68 : index
      %283 = memref.load %arg1[%c68] : memref<141xf32, #tpu.memory_space<smem>>
      %284 = vector.broadcast %283 : f32 to vector<8x512xf32>
      %285 = arith.mulf %284, %153 : vector<8x512xf32>
      %286 = arith.addf %282, %285 : vector<8x512xf32>
      %c69 = arith.constant 69 : index
      %287 = memref.load %arg1[%c69] : memref<141xf32, #tpu.memory_space<smem>>
      %288 = vector.broadcast %287 : f32 to vector<8x512xf32>
      %289 = arith.mulf %288, %176 : vector<8x512xf32>
      %290 = arith.addf %286, %289 : vector<8x512xf32>
      %291 = math.tanh %290 : vector<8x512xf32>
      %c100 = arith.constant 100 : index
      %292 = memref.load %arg1[%c100] : memref<141xf32, #tpu.memory_space<smem>>
      %c75 = arith.constant 75 : index
      %293 = memref.load %arg1[%c75] : memref<141xf32, #tpu.memory_space<smem>>
      %294 = vector.broadcast %293 : f32 to vector<8x512xf32>
      %295 = arith.mulf %294, %199 : vector<8x512xf32>
      %296 = vector.broadcast %292 : f32 to vector<8x512xf32>
      %297 = arith.addf %296, %295 : vector<8x512xf32>
      %c76 = arith.constant 76 : index
      %298 = memref.load %arg1[%c76] : memref<141xf32, #tpu.memory_space<smem>>
      %299 = vector.broadcast %298 : f32 to vector<8x512xf32>
      %300 = arith.mulf %299, %222 : vector<8x512xf32>
      %301 = arith.addf %297, %300 : vector<8x512xf32>
      %c77 = arith.constant 77 : index
      %302 = memref.load %arg1[%c77] : memref<141xf32, #tpu.memory_space<smem>>
      %303 = vector.broadcast %302 : f32 to vector<8x512xf32>
      %304 = arith.mulf %303, %245 : vector<8x512xf32>
      %305 = arith.addf %301, %304 : vector<8x512xf32>
      %c78 = arith.constant 78 : index
      %306 = memref.load %arg1[%c78] : memref<141xf32, #tpu.memory_space<smem>>
      %307 = vector.broadcast %306 : f32 to vector<8x512xf32>
      %308 = arith.mulf %307, %268 : vector<8x512xf32>
      %309 = arith.addf %305, %308 : vector<8x512xf32>
      %c79 = arith.constant 79 : index
      %310 = memref.load %arg1[%c79] : memref<141xf32, #tpu.memory_space<smem>>
      %311 = vector.broadcast %310 : f32 to vector<8x512xf32>
      %312 = arith.mulf %311, %291 : vector<8x512xf32>
      %313 = arith.addf %309, %312 : vector<8x512xf32>
      %314 = math.tanh %313 : vector<8x512xf32>
      %c101 = arith.constant 101 : index
      %315 = memref.load %arg1[%c101] : memref<141xf32, #tpu.memory_space<smem>>
      %c80 = arith.constant 80 : index
      %316 = memref.load %arg1[%c80] : memref<141xf32, #tpu.memory_space<smem>>
      %317 = vector.broadcast %316 : f32 to vector<8x512xf32>
      %318 = arith.mulf %317, %199 : vector<8x512xf32>
      %319 = vector.broadcast %315 : f32 to vector<8x512xf32>
      %320 = arith.addf %319, %318 : vector<8x512xf32>
      %c81 = arith.constant 81 : index
      %321 = memref.load %arg1[%c81] : memref<141xf32, #tpu.memory_space<smem>>
      %322 = vector.broadcast %321 : f32 to vector<8x512xf32>
      %323 = arith.mulf %322, %222 : vector<8x512xf32>
      %324 = arith.addf %320, %323 : vector<8x512xf32>
      %c82 = arith.constant 82 : index
      %325 = memref.load %arg1[%c82] : memref<141xf32, #tpu.memory_space<smem>>
      %326 = vector.broadcast %325 : f32 to vector<8x512xf32>
      %327 = arith.mulf %326, %245 : vector<8x512xf32>
      %328 = arith.addf %324, %327 : vector<8x512xf32>
      %c83 = arith.constant 83 : index
      %329 = memref.load %arg1[%c83] : memref<141xf32, #tpu.memory_space<smem>>
      %330 = vector.broadcast %329 : f32 to vector<8x512xf32>
      %331 = arith.mulf %330, %268 : vector<8x512xf32>
      %332 = arith.addf %328, %331 : vector<8x512xf32>
      %c84 = arith.constant 84 : index
      %333 = memref.load %arg1[%c84] : memref<141xf32, #tpu.memory_space<smem>>
      %334 = vector.broadcast %333 : f32 to vector<8x512xf32>
      %335 = arith.mulf %334, %291 : vector<8x512xf32>
      %336 = arith.addf %332, %335 : vector<8x512xf32>
      %337 = math.tanh %336 : vector<8x512xf32>
      %c102 = arith.constant 102 : index
      %338 = memref.load %arg1[%c102] : memref<141xf32, #tpu.memory_space<smem>>
      %c85 = arith.constant 85 : index
      %339 = memref.load %arg1[%c85] : memref<141xf32, #tpu.memory_space<smem>>
      %340 = vector.broadcast %339 : f32 to vector<8x512xf32>
      %341 = arith.mulf %340, %199 : vector<8x512xf32>
      %342 = vector.broadcast %338 : f32 to vector<8x512xf32>
      %343 = arith.addf %342, %341 : vector<8x512xf32>
      %c86 = arith.constant 86 : index
      %344 = memref.load %arg1[%c86] : memref<141xf32, #tpu.memory_space<smem>>
      %345 = vector.broadcast %344 : f32 to vector<8x512xf32>
      %346 = arith.mulf %345, %222 : vector<8x512xf32>
      %347 = arith.addf %343, %346 : vector<8x512xf32>
      %c87 = arith.constant 87 : index
      %348 = memref.load %arg1[%c87] : memref<141xf32, #tpu.memory_space<smem>>
      %349 = vector.broadcast %348 : f32 to vector<8x512xf32>
      %350 = arith.mulf %349, %245 : vector<8x512xf32>
      %351 = arith.addf %347, %350 : vector<8x512xf32>
      %c88 = arith.constant 88 : index
      %352 = memref.load %arg1[%c88] : memref<141xf32, #tpu.memory_space<smem>>
      %353 = vector.broadcast %352 : f32 to vector<8x512xf32>
      %354 = arith.mulf %353, %268 : vector<8x512xf32>
      %355 = arith.addf %351, %354 : vector<8x512xf32>
      %c89 = arith.constant 89 : index
      %356 = memref.load %arg1[%c89] : memref<141xf32, #tpu.memory_space<smem>>
      %357 = vector.broadcast %356 : f32 to vector<8x512xf32>
      %358 = arith.mulf %357, %291 : vector<8x512xf32>
      %359 = arith.addf %355, %358 : vector<8x512xf32>
      %360 = math.tanh %359 : vector<8x512xf32>
      %c103 = arith.constant 103 : index
      %361 = memref.load %arg1[%c103] : memref<141xf32, #tpu.memory_space<smem>>
      %c90 = arith.constant 90 : index
      %362 = memref.load %arg1[%c90] : memref<141xf32, #tpu.memory_space<smem>>
      %363 = vector.broadcast %362 : f32 to vector<8x512xf32>
      %364 = arith.mulf %363, %199 : vector<8x512xf32>
      %365 = vector.broadcast %361 : f32 to vector<8x512xf32>
      %366 = arith.addf %365, %364 : vector<8x512xf32>
      %c91 = arith.constant 91 : index
      %367 = memref.load %arg1[%c91] : memref<141xf32, #tpu.memory_space<smem>>
      %368 = vector.broadcast %367 : f32 to vector<8x512xf32>
      %369 = arith.mulf %368, %222 : vector<8x512xf32>
      %370 = arith.addf %366, %369 : vector<8x512xf32>
      %c92 = arith.constant 92 : index
      %371 = memref.load %arg1[%c92] : memref<141xf32, #tpu.memory_space<smem>>
      %372 = vector.broadcast %371 : f32 to vector<8x512xf32>
      %373 = arith.mulf %372, %245 : vector<8x512xf32>
      %374 = arith.addf %370, %373 : vector<8x512xf32>
      %c93 = arith.constant 93 : index
      %375 = memref.load %arg1[%c93] : memref<141xf32, #tpu.memory_space<smem>>
      %376 = vector.broadcast %375 : f32 to vector<8x512xf32>
      %377 = arith.mulf %376, %268 : vector<8x512xf32>
      %378 = arith.addf %374, %377 : vector<8x512xf32>
      %c94 = arith.constant 94 : index
      %379 = memref.load %arg1[%c94] : memref<141xf32, #tpu.memory_space<smem>>
      %380 = vector.broadcast %379 : f32 to vector<8x512xf32>
      %381 = arith.mulf %380, %291 : vector<8x512xf32>
      %382 = arith.addf %378, %381 : vector<8x512xf32>
      %383 = math.tanh %382 : vector<8x512xf32>
      %c104 = arith.constant 104 : index
      %384 = memref.load %arg1[%c104] : memref<141xf32, #tpu.memory_space<smem>>
      %c95 = arith.constant 95 : index
      %385 = memref.load %arg1[%c95] : memref<141xf32, #tpu.memory_space<smem>>
      %386 = vector.broadcast %385 : f32 to vector<8x512xf32>
      %387 = arith.mulf %386, %199 : vector<8x512xf32>
      %388 = vector.broadcast %384 : f32 to vector<8x512xf32>
      %389 = arith.addf %388, %387 : vector<8x512xf32>
      %c96 = arith.constant 96 : index
      %390 = memref.load %arg1[%c96] : memref<141xf32, #tpu.memory_space<smem>>
      %391 = vector.broadcast %390 : f32 to vector<8x512xf32>
      %392 = arith.mulf %391, %222 : vector<8x512xf32>
      %393 = arith.addf %389, %392 : vector<8x512xf32>
      %c97 = arith.constant 97 : index
      %394 = memref.load %arg1[%c97] : memref<141xf32, #tpu.memory_space<smem>>
      %395 = vector.broadcast %394 : f32 to vector<8x512xf32>
      %396 = arith.mulf %395, %245 : vector<8x512xf32>
      %397 = arith.addf %393, %396 : vector<8x512xf32>
      %c98 = arith.constant 98 : index
      %398 = memref.load %arg1[%c98] : memref<141xf32, #tpu.memory_space<smem>>
      %399 = vector.broadcast %398 : f32 to vector<8x512xf32>
      %400 = arith.mulf %399, %268 : vector<8x512xf32>
      %401 = arith.addf %397, %400 : vector<8x512xf32>
      %c99 = arith.constant 99 : index
      %402 = memref.load %arg1[%c99] : memref<141xf32, #tpu.memory_space<smem>>
      %403 = vector.broadcast %402 : f32 to vector<8x512xf32>
      %404 = arith.mulf %403, %291 : vector<8x512xf32>
      %405 = arith.addf %401, %404 : vector<8x512xf32>
      %406 = math.tanh %405 : vector<8x512xf32>
      %c130 = arith.constant 130 : index
      %407 = memref.load %arg1[%c130] : memref<141xf32, #tpu.memory_space<smem>>
      %c105 = arith.constant 105 : index
      %408 = memref.load %arg1[%c105] : memref<141xf32, #tpu.memory_space<smem>>
      %409 = vector.broadcast %408 : f32 to vector<8x512xf32>
      %410 = arith.mulf %409, %314 : vector<8x512xf32>
      %411 = vector.broadcast %407 : f32 to vector<8x512xf32>
      %412 = arith.addf %411, %410 : vector<8x512xf32>
      %c106 = arith.constant 106 : index
      %413 = memref.load %arg1[%c106] : memref<141xf32, #tpu.memory_space<smem>>
      %414 = vector.broadcast %413 : f32 to vector<8x512xf32>
      %415 = arith.mulf %414, %337 : vector<8x512xf32>
      %416 = arith.addf %412, %415 : vector<8x512xf32>
      %c107 = arith.constant 107 : index
      %417 = memref.load %arg1[%c107] : memref<141xf32, #tpu.memory_space<smem>>
      %418 = vector.broadcast %417 : f32 to vector<8x512xf32>
      %419 = arith.mulf %418, %360 : vector<8x512xf32>
      %420 = arith.addf %416, %419 : vector<8x512xf32>
      %c108 = arith.constant 108 : index
      %421 = memref.load %arg1[%c108] : memref<141xf32, #tpu.memory_space<smem>>
      %422 = vector.broadcast %421 : f32 to vector<8x512xf32>
      %423 = arith.mulf %422, %383 : vector<8x512xf32>
      %424 = arith.addf %420, %423 : vector<8x512xf32>
      %c109 = arith.constant 109 : index
      %425 = memref.load %arg1[%c109] : memref<141xf32, #tpu.memory_space<smem>>
      %426 = vector.broadcast %425 : f32 to vector<8x512xf32>
      %427 = arith.mulf %426, %406 : vector<8x512xf32>
      %428 = arith.addf %424, %427 : vector<8x512xf32>
      %429 = math.tanh %428 : vector<8x512xf32>
      %c131 = arith.constant 131 : index
      %430 = memref.load %arg1[%c131] : memref<141xf32, #tpu.memory_space<smem>>
      %c110 = arith.constant 110 : index
      %431 = memref.load %arg1[%c110] : memref<141xf32, #tpu.memory_space<smem>>
      %432 = vector.broadcast %431 : f32 to vector<8x512xf32>
      %433 = arith.mulf %432, %314 : vector<8x512xf32>
      %434 = vector.broadcast %430 : f32 to vector<8x512xf32>
      %435 = arith.addf %434, %433 : vector<8x512xf32>
      %c111 = arith.constant 111 : index
      %436 = memref.load %arg1[%c111] : memref<141xf32, #tpu.memory_space<smem>>
      %437 = vector.broadcast %436 : f32 to vector<8x512xf32>
      %438 = arith.mulf %437, %337 : vector<8x512xf32>
      %439 = arith.addf %435, %438 : vector<8x512xf32>
      %c112 = arith.constant 112 : index
      %440 = memref.load %arg1[%c112] : memref<141xf32, #tpu.memory_space<smem>>
      %441 = vector.broadcast %440 : f32 to vector<8x512xf32>
      %442 = arith.mulf %441, %360 : vector<8x512xf32>
      %443 = arith.addf %439, %442 : vector<8x512xf32>
      %c113 = arith.constant 113 : index
      %444 = memref.load %arg1[%c113] : memref<141xf32, #tpu.memory_space<smem>>
      %445 = vector.broadcast %444 : f32 to vector<8x512xf32>
      %446 = arith.mulf %445, %383 : vector<8x512xf32>
      %447 = arith.addf %443, %446 : vector<8x512xf32>
      %c114 = arith.constant 114 : index
      %448 = memref.load %arg1[%c114] : memref<141xf32, #tpu.memory_space<smem>>
      %449 = vector.broadcast %448 : f32 to vector<8x512xf32>
      %450 = arith.mulf %449, %406 : vector<8x512xf32>
      %451 = arith.addf %447, %450 : vector<8x512xf32>
      %452 = math.tanh %451 : vector<8x512xf32>
      %c132 = arith.constant 132 : index
      %453 = memref.load %arg1[%c132] : memref<141xf32, #tpu.memory_space<smem>>
      %c115 = arith.constant 115 : index
      %454 = memref.load %arg1[%c115] : memref<141xf32, #tpu.memory_space<smem>>
      %455 = vector.broadcast %454 : f32 to vector<8x512xf32>
      %456 = arith.mulf %455, %314 : vector<8x512xf32>
      %457 = vector.broadcast %453 : f32 to vector<8x512xf32>
      %458 = arith.addf %457, %456 : vector<8x512xf32>
      %c116 = arith.constant 116 : index
      %459 = memref.load %arg1[%c116] : memref<141xf32, #tpu.memory_space<smem>>
      %460 = vector.broadcast %459 : f32 to vector<8x512xf32>
      %461 = arith.mulf %460, %337 : vector<8x512xf32>
      %462 = arith.addf %458, %461 : vector<8x512xf32>
      %c117 = arith.constant 117 : index
      %463 = memref.load %arg1[%c117] : memref<141xf32, #tpu.memory_space<smem>>
      %464 = vector.broadcast %463 : f32 to vector<8x512xf32>
      %465 = arith.mulf %464, %360 : vector<8x512xf32>
      %466 = arith.addf %462, %465 : vector<8x512xf32>
      %c118 = arith.constant 118 : index
      %467 = memref.load %arg1[%c118] : memref<141xf32, #tpu.memory_space<smem>>
      %468 = vector.broadcast %467 : f32 to vector<8x512xf32>
      %469 = arith.mulf %468, %383 : vector<8x512xf32>
      %470 = arith.addf %466, %469 : vector<8x512xf32>
      %c119 = arith.constant 119 : index
      %471 = memref.load %arg1[%c119] : memref<141xf32, #tpu.memory_space<smem>>
      %472 = vector.broadcast %471 : f32 to vector<8x512xf32>
      %473 = arith.mulf %472, %406 : vector<8x512xf32>
      %474 = arith.addf %470, %473 : vector<8x512xf32>
      %475 = math.tanh %474 : vector<8x512xf32>
      %c133 = arith.constant 133 : index
      %476 = memref.load %arg1[%c133] : memref<141xf32, #tpu.memory_space<smem>>
      %c120 = arith.constant 120 : index
      %477 = memref.load %arg1[%c120] : memref<141xf32, #tpu.memory_space<smem>>
      %478 = vector.broadcast %477 : f32 to vector<8x512xf32>
      %479 = arith.mulf %478, %314 : vector<8x512xf32>
      %480 = vector.broadcast %476 : f32 to vector<8x512xf32>
      %481 = arith.addf %480, %479 : vector<8x512xf32>
      %c121 = arith.constant 121 : index
      %482 = memref.load %arg1[%c121] : memref<141xf32, #tpu.memory_space<smem>>
      %483 = vector.broadcast %482 : f32 to vector<8x512xf32>
      %484 = arith.mulf %483, %337 : vector<8x512xf32>
      %485 = arith.addf %481, %484 : vector<8x512xf32>
      %c122 = arith.constant 122 : index
      %486 = memref.load %arg1[%c122] : memref<141xf32, #tpu.memory_space<smem>>
      %487 = vector.broadcast %486 : f32 to vector<8x512xf32>
      %488 = arith.mulf %487, %360 : vector<8x512xf32>
      %489 = arith.addf %485, %488 : vector<8x512xf32>
      %c123 = arith.constant 123 : index
      %490 = memref.load %arg1[%c123] : memref<141xf32, #tpu.memory_space<smem>>
      %491 = vector.broadcast %490 : f32 to vector<8x512xf32>
      %492 = arith.mulf %491, %383 : vector<8x512xf32>
      %493 = arith.addf %489, %492 : vector<8x512xf32>
      %c124 = arith.constant 124 : index
      %494 = memref.load %arg1[%c124] : memref<141xf32, #tpu.memory_space<smem>>
      %495 = vector.broadcast %494 : f32 to vector<8x512xf32>
      %496 = arith.mulf %495, %406 : vector<8x512xf32>
      %497 = arith.addf %493, %496 : vector<8x512xf32>
      %498 = math.tanh %497 : vector<8x512xf32>
      %c134 = arith.constant 134 : index
      %499 = memref.load %arg1[%c134] : memref<141xf32, #tpu.memory_space<smem>>
      %c125 = arith.constant 125 : index
      %500 = memref.load %arg1[%c125] : memref<141xf32, #tpu.memory_space<smem>>
      %501 = vector.broadcast %500 : f32 to vector<8x512xf32>
      %502 = arith.mulf %501, %314 : vector<8x512xf32>
      %503 = vector.broadcast %499 : f32 to vector<8x512xf32>
      %504 = arith.addf %503, %502 : vector<8x512xf32>
      %c126 = arith.constant 126 : index
      %505 = memref.load %arg1[%c126] : memref<141xf32, #tpu.memory_space<smem>>
      %506 = vector.broadcast %505 : f32 to vector<8x512xf32>
      %507 = arith.mulf %506, %337 : vector<8x512xf32>
      %508 = arith.addf %504, %507 : vector<8x512xf32>
      %c127 = arith.constant 127 : index
      %509 = memref.load %arg1[%c127] : memref<141xf32, #tpu.memory_space<smem>>
      %510 = vector.broadcast %509 : f32 to vector<8x512xf32>
      %511 = arith.mulf %510, %360 : vector<8x512xf32>
      %512 = arith.addf %508, %511 : vector<8x512xf32>
      %c128 = arith.constant 128 : index
      %513 = memref.load %arg1[%c128] : memref<141xf32, #tpu.memory_space<smem>>
      %514 = vector.broadcast %513 : f32 to vector<8x512xf32>
      %515 = arith.mulf %514, %383 : vector<8x512xf32>
      %516 = arith.addf %512, %515 : vector<8x512xf32>
      %c129 = arith.constant 129 : index
      %517 = memref.load %arg1[%c129] : memref<141xf32, #tpu.memory_space<smem>>
      %518 = vector.broadcast %517 : f32 to vector<8x512xf32>
      %519 = arith.mulf %518, %406 : vector<8x512xf32>
      %520 = arith.addf %516, %519 : vector<8x512xf32>
      %521 = math.tanh %520 : vector<8x512xf32>
      %c140 = arith.constant 140 : index
      %522 = memref.load %arg1[%c140] : memref<141xf32, #tpu.memory_space<smem>>
      %c135 = arith.constant 135 : index
      %523 = memref.load %arg1[%c135] : memref<141xf32, #tpu.memory_space<smem>>
      %524 = vector.broadcast %523 : f32 to vector<8x512xf32>
      %525 = arith.mulf %524, %429 : vector<8x512xf32>
      %526 = vector.broadcast %522 : f32 to vector<8x512xf32>
      %527 = arith.addf %526, %525 : vector<8x512xf32>
      %c136 = arith.constant 136 : index
      %528 = memref.load %arg1[%c136] : memref<141xf32, #tpu.memory_space<smem>>
      %529 = vector.broadcast %528 : f32 to vector<8x512xf32>
      %530 = arith.mulf %529, %452 : vector<8x512xf32>
      %531 = arith.addf %527, %530 : vector<8x512xf32>
      %c137 = arith.constant 137 : index
      %532 = memref.load %arg1[%c137] : memref<141xf32, #tpu.memory_space<smem>>
      %533 = vector.broadcast %532 : f32 to vector<8x512xf32>
      %534 = arith.mulf %533, %475 : vector<8x512xf32>
      %535 = arith.addf %531, %534 : vector<8x512xf32>
      %c138 = arith.constant 138 : index
      %536 = memref.load %arg1[%c138] : memref<141xf32, #tpu.memory_space<smem>>
      %537 = vector.broadcast %536 : f32 to vector<8x512xf32>
      %538 = arith.mulf %537, %498 : vector<8x512xf32>
      %539 = arith.addf %535, %538 : vector<8x512xf32>
      %c139 = arith.constant 139 : index
      %540 = memref.load %arg1[%c139] : memref<141xf32, #tpu.memory_space<smem>>
      %541 = vector.broadcast %540 : f32 to vector<8x512xf32>
      %542 = arith.mulf %541, %521 : vector<8x512xf32>
      %543 = arith.addf %539, %542 : vector<8x512xf32>
      %c0_3 = arith.constant 0 : index
      %544 = arith.index_cast %2 : i32 to index
      %545 = vector.load %arg4[%c0_3, %544] : memref<8x8192xf32, #tpu.memory_space<vmem>>, vector<8x512xf32>
      tpu.vector_store %arg4[%c0_3, %544], %543 {strides = array<i32>} : memref<8x8192xf32, #tpu.memory_space<vmem>>, vector<8x512xf32>,
    }
    %c16_i32_0 = arith.constant 16 : i32
    return
  }
  func.func @transform_0(%arg0: i32) -> i32 {
    %c0_i32 = arith.constant 0 : i32
    %c0_i32_0 = arith.constant 0 : i32
    return %c0_i32 : i32
  }
  func.func @transform_1(%arg0: i32) -> (i32, i32) {
    %c0_i32 = arith.constant 0 : i32
    %c0_i32_0 = arith.constant 0 : i32
    return %arg0, %c0_i32 : i32, i32
  }
  func.func @transform_2(%arg0: i32) -> (i32, i32) {
    %c0_i32 = arith.constant 0 : i32
    %c0_i32_0 = arith.constant 0 : i32
    return %arg0, %c0_i32 : i32, i32
  }
  func.func @transform_3(%arg0: i32) -> (i32, i32) {
    %c0_i32 = arith.constant 0 : i32
    %c0_i32_0 = arith.constant 0 : i32
    return %arg0, %c0_i32 : i32, i32
  }
}

</mosaic_0001>

<bundles_post_ra>
// kernel: net_forward.1
= control target key start
LH: loop header
LB: loop body
LE: loop exit
PB: predicated region body
PF: predicated region fallthrough
CT: control target
= control target key end

     0   :  { %8 = vsyncpa [#allocation3], 0  ;;  %s2851_s0 = inlined_call_operand.vmem [shape: f32[141], index: 0, kind: input, shape index: {}]   ;;  %s2852_s1 = inlined_call_operand.vmem [shape: f32[8,8192], index: 1, kind: input, shape index: {}]   ;;  %s2853_s2 = inlined_call_operand.vmem [shape: f32[8,8192], index: 2, kind: input, shape index: {}]   ;;  %s2854_s3 = inlined_call_operand.vmem [shape: f32[8,8192], index: 3, kind: output, shape index: {}]  }
   0x1   :  { %s15_s14 = sshll.u32 %s2851_s0, 4  ;;  %s16_s14 = int_to_ptr.vmem [resolvable:$true] %s15_s14 }
   0x2   :  { %s1725_s15 = scalar_lea.vmem %s16_s14, 32  ;;  %p1730_p1 = scmp.lt.s32.totalorder %s16_s14, %s16_s14 }
   0x3   :  { %p1726_p0 = scmp.ne.s32.totalorder %s16_s14, %s1725_s15  ;;  %p1731_p2 = scmp.lt.s32.totalorder %s1725_s15, %s1725_s15 }
   0x5   :  { %p1732_p3 = por %p1731_p2, %p1730_p1 }
   0x7   :  { %p1733_p4 = pnand %p1732_p3, %p1726_p0 }
   0x9   :  { %1736 = shalt.err (!%p1733_p4)
}
   0xa   :  { %s1747_s16 = smov [#allocation2]  }
   0xb   :  { %18 = dma.vmem_to_smem %s16_s14, 32, %s1747_s16, [#allocation3]  }
   0xc   :  { %1741 = dma.done.wait [#allocation3], 32  }
   0xd   :  { %1742 = vsyncadd [#allocation3], 4294967264 }
   0xe   :  { %26 = sfence }
   0xf   :  { %s1771_s17 = smov 0  }
  0x10 LB: > { %s1375_s0 = sld [smem:[#allocation2 + $0xa]]  ;;  %s49_s18 = sld [smem:[#allocation2]]  ;;  %s1745_s17 = sphi %s1771_s17, %s32_s17  }
  0x11   : > { %s1372_s19 = sshll.u32 %s1745_s17, 9  ;;  %s1376_s20 = sld [smem:[#allocation2 + $0x1]] }
  0x12   : > { %s34_s21 = sshra.s32 %s1372_s19, 7  ;;  %s1777_s22 = sld [smem:[#allocation2 + $0xb]] }
  0x13   : > { %s1779_s23 = sshll.u32 %s34_s21, 3  ;;  %s1378_s24 = sld [smem:[#allocation2 + $0x2]] }
  0x14   : > { %s37_s27 = scalar_lea.vmem %s2852_s1, %s1779_s23  ;;  %s43_s30 = scalar_lea.vmem %s2853_s2, %s1779_s23 }
  0x15   : > { %v1789_v0 = vld [vmem:[%s37_s27] sm:$0xff]  ;;  %v1791_v1 = vld [vmem:[%s37_s27 + $0x8] sm:$0xff]  ;;  %v1793_v2 = vld [vmem:[%s37_s27 + $0x10] sm:$0xff]  ;;  %s1379_s4 = sld [smem:[#allocation2 + $0x3]]  ;;  %s1809_s5 = sld [smem:[#allocation2 + $0x4]] }
  0x16   : > { %v1795_v3 = vld [vmem:[%s37_s27 + $0x18] sm:$0xff]  ;;  %v1797_v4 = vld [vmem:[%s43_s30] sm:$0xff]  ;;  %v50_v5 = vstv %s49_s18  ;;  %v55_v6 = vstv %s1375_s0  ;;  %s1816_s6 = sld [smem:[#allocation2 + $0xc]]  ;;  %s1818_s7 = sld [smem:[#allocation2 + $0x5]] }
  0x17   : > { %v1799_v7 = vld [vmem:[%s43_s30 + $0x8] sm:$0xff]  ;;  %v1801_v8 = vld [vmem:[%s43_s30 + $0x10] sm:$0xff]  ;;  %v1803_v9 = vld [vmem:[%s43_s30 + $0x18] sm:$0xff]  ;;  %v51_v10 = vmul.f32 %v50_v5, %v1789_v0  ;;  %v52_v11 = vmul.f32 %v50_v5, %v1791_v1  ;;  %v53_v12 = vmul.f32 %v50_v5, %v1793_v2  ;;  %v54_v13 = vmul.f32 %v50_v5, %v1795_v3  ;;  %s1827_s8 = sld [smem:[#allocation2 + $0x6]]  ;;  %s1831_s9 = sld [smem:[#allocation2 + $0xd]] }
  0x18   : > { %v61_v14 = vstv %s1376_s20  ;;  %v81_v24 = vstv %s1777_s22  ;;  %s1833_s10 = sld [smem:[#allocation2 + $0x7]]  ;;  %s1835_s11 = sld [smem:[#allocation2 + $0x8]] }
  0x19   : > { %v56_v15 = vadd.f32 %v55_v6, %v51_v10  ;;  %v57_v16 = vadd.f32 %v55_v6, %v52_v11  ;;  %v58_v17 = vadd.f32 %v55_v6, %v53_v12  ;;  %v59_v18 = vadd.f32 %v55_v6, %v54_v13  ;;  %s1848_s12 = sld [smem:[#allocation2 + $0xe]]  ;;  %s1856_s13 = sld [smem:[#allocation2 + $0x9]] }
  0x1a   : > { %v62_v19 = vmul.f32 %v61_v14, %v1797_v4  ;;  %v63_v20 = vmul.f32 %v61_v14, %v1799_v7  ;;  %v64_v21 = vmul.f32 %v61_v14, %v1801_v8  ;;  %v65_v22 = vmul.f32 %v61_v14, %v1803_v9  ;;  %s1858_s14 = sld [smem:[#allocation2 + $0xf]]  ;;  %s1874_s15 = sld [smem:[#allocation2 + $0x28]] }
  0x1b   : > { %v76_v23 = vstv %s1378_s24  ;;  %v87_v25 = vstv %s1379_s4  ;;  %v102_v42 = vstv %s1809_s5  ;;  %s1876_s16 = sld [smem:[#allocation2 + $0x10]]  ;;  %s1888_s0 = sld [smem:[#allocation2 + $0x11]] }
  0x1c   : > { %v66_v26 = vadd.f32 %v62_v19, %v56_v15  ;;  %v67_v27 = vadd.f32 %v63_v20, %v57_v16  ;;  %v68_v28 = vadd.f32 %v64_v21, %v58_v17  ;;  %v69_v29 = vadd.f32 %v65_v22, %v59_v18  ;;  %s1900_s18 = sld [smem:[#allocation2 + $0x12]]  ;;  %s1902_s19 = sld [smem:[#allocation2 + $0x13]] }
  0x1d   : > { %v77_v30 = vmul.f32 %v76_v23, %v1789_v0  ;;  %v78_v31 = vmul.f32 %v76_v23, %v1791_v1  ;;  %v79_v32 = vmul.f32 %v76_v23, %v1793_v2  ;;  %v80_v33 = vmul.f32 %v76_v23, %v1795_v3  ;;  %s1912_s20 = sld [smem:[#allocation2 + $0x29]]  ;;  %s1914_s21 = sld [smem:[#allocation2 + $0x14]] }
  0x1e   : > { %1525 = vtanh.f32 %v66_v26  ;;  %v88_v34 = vmul.f32 %v87_v25, %v1797_v4  ;;  %v89_v35 = vmul.f32 %v87_v25, %v1799_v7  ;;  %v90_v36 = vmul.f32 %v87_v25, %v1801_v8  ;;  %s1925_s22 = sld [smem:[#allocation2 + $0x15]]  ;;  %s1927_s24 = sld [smem:[#allocation2 + $0x16]] }
  0x1f   : > { %1527 = vtanh.f32 %v67_v27  ;;  %v82_v37 = vadd.f32 %v81_v24, %v77_v30  ;;  %v83_v38 = vadd.f32 %v81_v24, %v78_v31  ;;  %v84_v39 = vadd.f32 %v81_v24, %v79_v32  ;;  %s1953_s25 = sld [smem:[#allocation2 + $0x17]]  ;;  %s1962_s26 = sld [smem:[#allocation2 + $0x18]] }
  0x20   : > { %1529 = vtanh.f32 %v68_v28  ;;  %v85_v40 = vadd.f32 %v81_v24, %v80_v33  ;;  %v91_v41 = vmul.f32 %v87_v25, %v1803_v9  ;;  %v103_v47 = vmul.f32 %v102_v42, %v1789_v0  ;;  %s1970_s27 = sld [smem:[#allocation2 + $0x2a]]  ;;  %s1972_s28 = sld [smem:[#allocation2 + $0x19]] }
  0x21   : > { %1531 = vtanh.f32 %v69_v29  ;;  %v92_v43 = vadd.f32 %v88_v34, %v82_v37  ;;  %v93_v44 = vadd.f32 %v89_v35, %v83_v38  ;;  %v94_v45 = vadd.f32 %v90_v36, %v84_v39  ;;  %s1984_s29 = sld [smem:[#allocation2 + $0x1a]]  ;;  %s1987_s30 = sld [smem:[#allocation2 + $0x1b]] }
  0x22   : > { %v95_v46 = vadd.f32 %v91_v41, %v85_v40  ;;  %v104_v48 = vmul.f32 %v102_v42, %v1791_v1  ;;  %v105_v49 = vmul.f32 %v102_v42, %v1793_v2  ;;  %v106_v50 = vmul.f32 %v102_v42, %v1795_v3  ;;  %s1989_s4 = sld [smem:[#allocation2 + $0x1c]]  ;;  %s2005_s5 = sld [smem:[#allocation2 + $0x1d]] }
  0x23   : > { %1533 = vtanh.f32 %v92_v43  ;;  %v107_v51 = vstv %s1816_s6  ;;  %v113_v52 = vstv %s1818_s7  ;;  %v128_v61 = vstv %s1827_s8  ;;  %s2007_s6 = sld [smem:[#allocation2 + $0x1e]]  ;;  %s2026_s7 = sld [smem:[#allocation2 + $0x2b]] }
  0x24   : > { %1535 = vtanh.f32 %v93_v44  ;;  %v108_v53 = vadd.f32 %v107_v51, %v103_v47  ;;  %v109_v54 = vadd.f32 %v107_v51, %v104_v48  ;;  %v110_v55 = vadd.f32 %v107_v51, %v105_v49  ;;  %s2029_s8 = sld [smem:[#allocation2 + $0x1f]]  ;;  %s32_s17 = sadd.s32 1, %s1745_s17  }
  0x25   : > { %1537 = vtanh.f32 %v94_v45  ;;  %v111_v56 = vadd.f32 %v107_v51, %v106_v50  ;;  %v114_v57 = vmul.f32 %v113_v52, %v1797_v4  ;;  %v115_v58 = vmul.f32 %v113_v52, %v1799_v7  ;;  %p29_p5 = scmp.ge.s32.totalorder %s32_s17, 16  }
  0x26   : > { %1539 = vtanh.f32 %v95_v46  ;;  %v116_v59 = vmul.f32 %v113_v52, %v1801_v8  ;;  %v117_v60 = vmul.f32 %v113_v52, %v1803_v9  ;;  %v129_v5 = vmul.f32 %v128_v61, %v1789_v0 }
  0x27   : > { %v118_v62 = vadd.f32 %v114_v57, %v108_v53  ;;  %v119_v63 = vadd.f32 %v115_v58, %v109_v54  ;;  %v130_v6 = vmul.f32 %v128_v61, %v1791_v1  ;;  %v131_v13 = vmul.f32 %v128_v61, %v1793_v2 }
  0x28   : > { %v1852_v10 = vpop.eup %1525  ;;  %v120_v11 = vadd.f32 %v116_v59, %v110_v55  ;;  %v121_v12 = vadd.f32 %v117_v60, %v111_v56  ;;  %v132_v14 = vmul.f32 %v128_v61, %v1795_v3  ;;  %v133_v16 = vstv %s1831_s9  ;;  %s2031_s9 = sld [smem:[#allocation2 + $0x20]] }
  0x29   : > { %v1860_v15 = vpop.eup %1527  ;;  %1541 = vtanh.f32 %v118_v62  ;;  %v139_v17 = vstv %s1833_s10  ;;  %v154_v18 = vstv %s1835_s11  ;;  %v134_v20 = vadd.f32 %v133_v16, %v129_v5  ;;  %s2044_s10 = sld [smem:[#allocation2 + $0x21]]  ;;  %s2059_s11 = sld [smem:[#allocation2 + $0x22]] }
  0x2a   : > { %v1865_v19 = vpop.eup %1529  ;;  %1543 = vtanh.f32 %v119_v63  ;;  %v135_v21 = vadd.f32 %v133_v16, %v130_v6  ;;  %v136_v22 = vadd.f32 %v133_v16, %v131_v13  ;;  %v137_v24 = vadd.f32 %v133_v16, %v132_v14 }
  0x2b   : > { %v1867_v23 = vpop.eup %1531  ;;  %1545 = vtanh.f32 %v120_v11  ;;  %v140_v25 = vmul.f32 %v139_v17, %v1797_v4  ;;  %v141_v26 = vmul.f32 %v139_v17, %v1799_v7  ;;  %v142_v27 = vmul.f32 %v139_v17, %v1801_v8 }
  0x2c   : > { %1547 = vtanh.f32 %v121_v12  ;;  %v143_v28 = vmul.f32 %v139_v17, %v1803_v9  ;;  %v155_v29 = vmul.f32 %v154_v18, %v1789_v0  ;;  %v156_v33 = vmul.f32 %v154_v18, %v1791_v1 }
  0x2d   : > { %v1878_v30 = vpop.eup %1533  ;;  %v144_v31 = vadd.f32 %v140_v25, %v134_v20  ;;  %v145_v32 = vadd.f32 %v141_v26, %v135_v21  ;;  %v157_v34 = vmul.f32 %v154_v18, %v1793_v2  ;;  %v146_v36 = vadd.f32 %v142_v27, %v136_v22 }
  0x2e   : > { %v1882_v35 = vpop.eup %1535  ;;  %v147_v37 = vadd.f32 %v143_v28, %v137_v24  ;;  %v158_v0 = vmul.f32 %v154_v18, %v1795_v3  ;;  %v159_v38 = vstv %s1848_s12  ;;  %v165_v43 = vstv %s1856_s13  ;;  %s2061_s12 = sld [smem:[#allocation2 + $0x23]]  ;;  %s2072_s13 = sld [smem:[#allocation2 + $0x2c]] }
  0x2f   : > { %v1886_v39 = vpop.eup %1537  ;;  %1549 = vtanh.f32 %v144_v31  ;;  %v160_v40 = vadd.f32 %v159_v38, %v155_v29  ;;  %v161_v41 = vadd.f32 %v159_v38, %v156_v33  ;;  %v162_v42 = vadd.f32 %v159_v38, %v157_v34 }
  0x30   : > { %v1890_v1 = vpop.eup %1539  ;;  %1551 = vtanh.f32 %v145_v32  ;;  %v163_v2 = vadd.f32 %v159_v38, %v158_v0  ;;  %v180_v44 = vstv %s1858_s14  ;;  %v166_v45 = vmul.f32 %v165_v43, %v1797_v4  ;;  %s2074_s14 = sld [smem:[#allocation2 + $0x24]] }
  0x31   : > { %1553 = vtanh.f32 %v146_v36  ;;  %v167_v3 = vmul.f32 %v165_v43, %v1799_v7  ;;  %v168_v46 = vmul.f32 %v165_v43, %v1801_v8  ;;  %v169_v47 = vmul.f32 %v165_v43, %v1803_v9 }
  0x32   : > { %1555 = vtanh.f32 %v147_v37  ;;  %v181_v48 = vmul.f32 %v1852_v10, %v180_v44  ;;  %v182_v49 = vmul.f32 %v1860_v15, %v180_v44  ;;  %v170_v4 = vadd.f32 %v166_v45, %v160_v40 }
  0x33   : > { %v1904_v50 = vpop.eup %1541  ;;  %v171_v51 = vadd.f32 %v167_v3, %v161_v41  ;;  %v172_v7 = vadd.f32 %v168_v46, %v162_v42  ;;  %v183_v52 = vmul.f32 %v1865_v19, %v180_v44  ;;  %v173_v53 = vadd.f32 %v169_v47, %v163_v2 }
  0x34   : > { %v1907_v8 = vpop.eup %1543  ;;  %v184_v9 = vmul.f32 %v1867_v23, %v180_v44  ;;  %v185_v54 = vstv %s1874_s15  ;;  %v191_v55 = vstv %s1876_s16  ;;  %1557 = vtanh.f32 %v170_v4  ;;  %s2082_s15 = sld [smem:[#allocation2 + $0x25]]  ;;  %s2094_s16 = sld [smem:[#allocation2 + $0x26]] }
  0x35   : > { %v1916_v56 = vpop.eup %1545  ;;  %v186_v57 = vadd.f32 %v185_v54, %v181_v48  ;;  %v187_v58 = vadd.f32 %v185_v54, %v182_v49  ;;  %v188_v59 = vadd.f32 %v185_v54, %v183_v52  ;;  %1559 = vtanh.f32 %v171_v51 }
  0x36   : > { %v1918_v60 = vpop.eup %1547  ;;  %v189_v61 = vadd.f32 %v185_v54, %v184_v9  ;;  %v192_v62 = vmul.f32 %v1878_v30, %v191_v55  ;;  %v193_v63 = vmul.f32 %v1882_v35, %v191_v55  ;;  %1561 = vtanh.f32 %v172_v7 }
  0x37   : > { %v194_v5 = vmul.f32 %v1886_v39, %v191_v55  ;;  %v195_v6 = vmul.f32 %v1890_v1, %v191_v55  ;;  %v201_v11 = vstv %s1888_s0  ;;  %1563 = vtanh.f32 %v173_v53  ;;  %s2096_s0 = sld [smem:[#allocation2 + $0x27]] }
  0x38   : > { %v196_v12 = vadd.f32 %v192_v62, %v186_v57  ;;  %v197_v13 = vadd.f32 %v193_v63, %v187_v58  ;;  %v202_v14 = vmul.f32 %v1904_v50, %v201_v11  ;;  %v203_v20 = vmul.f32 %v1907_v8, %v201_v11 }
  0x39   : > { %v1930_v16 = vpop.eup %1549  ;;  %v198_v17 = vadd.f32 %v194_v5, %v188_v59  ;;  %v199_v18 = vadd.f32 %v195_v6, %v189_v61  ;;  %v204_v21 = vmul.f32 %v1916_v56, %v201_v11  ;;  %v205_v24 = vmul.f32 %v1918_v60, %v201_v11 }
  0x3a   : > { %v1934_v22 = vpop.eup %1551  ;;  %v206_v25 = vadd.f32 %v202_v14, %v196_v12  ;;  %v211_v26 = vstv %s1900_s18  ;;  %v221_v27 = vstv %s1902_s19  ;;  %v207_v29 = vadd.f32 %v203_v20, %v197_v13  ;;  %s2110_s18 = sld [smem:[#allocation2 + $0x2d]]  ;;  %s2116_s19 = sld [smem:[#allocation2 + $0x46]] }
  0x3b   : > { %v1939_v28 = vpop.eup %1553  ;;  %v208_v31 = vadd.f32 %v204_v21, %v198_v17  ;;  %v212_v32 = vmul.f32 %v1930_v16, %v211_v26  ;;  %v213_v33 = vmul.f32 %v1934_v22, %v211_v26  ;;  %v209_v36 = vadd.f32 %v205_v24, %v199_v18 }
  0x3c   : > { %v1943_v34 = vpop.eup %1555  ;;  %v214_v37 = vmul.f32 %v1939_v28, %v211_v26  ;;  %v236_v0 = vstv %s1914_s21  ;;  %v241_v38 = vstv %s1912_s20  ;;  %v247_v49 = vstv %s1925_s22  ;;  %s2120_s20 = sld [smem:[#allocation2 + $0x2e]]  ;;  %s2122_s21 = sld [smem:[#allocation2 + $0x2f]] }
  0x3d   : > { %v215_v40 = vmul.f32 %v1943_v34, %v211_v26  ;;  %v216_v41 = vadd.f32 %v212_v32, %v206_v25  ;;  %v217_v42 = vadd.f32 %v213_v33, %v207_v29  ;;  %v237_v2 = vmul.f32 %v1852_v10, %v236_v0  ;;  %s2136_s22 = sld [smem:[#allocation2 + $0x30]] }
  0x3e   : > { %v218_v43 = vadd.f32 %v214_v37, %v208_v31  ;;  %v238_v44 = vmul.f32 %v1860_v15, %v236_v0  ;;  %v239_v45 = vmul.f32 %v1865_v19, %v236_v0  ;;  %v240_v3 = vmul.f32 %v1867_v23, %v236_v0  ;;  %v1955_v46 = vpop.eup %1557 }
  0x3f   : > { %v219_v47 = vadd.f32 %v215_v40, %v209_v36  ;;  %v242_v48 = vadd.f32 %v241_v38, %v237_v2  ;;  %v257_v4 = vstv %s1927_s24  ;;  %v1959_v51 = vpop.eup %1559  ;;  %v222_v7 = vmul.f32 %v1955_v46, %v221_v27  ;;  %s2151_s24 = sld [smem:[#allocation2 + $0x31]] }
  0x40   : > { %v243_v52 = vadd.f32 %v241_v38, %v238_v44  ;;  %v244_v53 = vadd.f32 %v241_v38, %v239_v45  ;;  %v245_v9 = vadd.f32 %v241_v38, %v240_v3  ;;  %v1964_v54 = vpop.eup %1561  ;;  %v223_v55 = vmul.f32 %v1959_v51, %v221_v27 }
  0x41   : > { %v248_v57 = vmul.f32 %v1878_v30, %v247_v49  ;;  %v249_v58 = vmul.f32 %v1882_v35, %v247_v49  ;;  %v250_v59 = vmul.f32 %v1886_v39, %v247_v49  ;;  %v1974_v61 = vpop.eup %1563  ;;  %v224_v62 = vmul.f32 %v1964_v54, %v221_v27 }
  0x42   : > { %v226_v63 = vadd.f32 %v222_v7, %v216_v41  ;;  %v251_v5 = vmul.f32 %v1890_v1, %v247_v49  ;;  %v258_v6 = vmul.f32 %v1904_v50, %v257_v4  ;;  %v225_v11 = vmul.f32 %v1974_v61, %v221_v27 }
  0x43   : > { %v227_v12 = vadd.f32 %v223_v55, %v217_v42  ;;  %v252_v13 = vadd.f32 %v248_v57, %v242_v48  ;;  %v253_v14 = vadd.f32 %v249_v58, %v243_v52  ;;  %v228_v17 = vadd.f32 %v224_v62, %v218_v43 }
  0x44   : > { %1565 = vtanh.f32 %v226_v63  ;;  %v254_v18 = vadd.f32 %v250_v59, %v244_v53  ;;  %v255_v20 = vadd.f32 %v251_v5, %v245_v9  ;;  %v229_v21 = vadd.f32 %v225_v11, %v219_v47 }
  0x45   : > { %1567 = vtanh.f32 %v227_v12  ;;  %v259_v24 = vmul.f32 %v1907_v8, %v257_v4  ;;  %v260_v25 = vmul.f32 %v1916_v56, %v257_v4  ;;  %v261_v26 = vmul.f32 %v1918_v60, %v257_v4 }
  0x46   : > { %1569 = vtanh.f32 %v228_v17  ;;  %v262_v29 = vadd.f32 %v258_v6, %v252_v13  ;;  %v267_v27 = vstv %s1953_s25  ;;  %v277_v41 = vstv %s1962_s26  ;;  %s2153_s25 = sld [smem:[#allocation2 + $0x32]]  ;;  %s2159_s26 = sld [smem:[#allocation2 + $0x47]] }
  0x47   : > { %1571 = vtanh.f32 %v229_v21  ;;  %v263_v31 = vadd.f32 %v259_v24, %v253_v14  ;;  %v264_v32 = vadd.f32 %v260_v25, %v254_v18  ;;  %v268_v33 = vmul.f32 %v1930_v16, %v267_v27 }
  0x48   : > { %v265_v36 = vadd.f32 %v261_v26, %v255_v20  ;;  %v269_v37 = vmul.f32 %v1934_v22, %v267_v27  ;;  %v270_v0 = vmul.f32 %v1939_v28, %v267_v27  ;;  %v271_v38 = vmul.f32 %v1943_v34, %v267_v27 }
  0x49   : > { %v272_v40 = vadd.f32 %v268_v33, %v262_v29  ;;  %v292_v42 = vstv %s1972_s28  ;;  %v297_v2 = vstv %s1970_s27  ;;  %v278_v3 = vmul.f32 %v1955_v46, %v277_v41  ;;  %s2161_s27 = sld [smem:[#allocation2 + $0x33]]  ;;  %s2176_s28 = sld [smem:[#allocation2 + $0x34]] }
  0x4a   : > { %v273_v43 = vadd.f32 %v269_v37, %v263_v31  ;;  %v274_v44 = vadd.f32 %v270_v0, %v264_v32  ;;  %v275_v45 = vadd.f32 %v271_v38, %v265_v36  ;;  %v279_v47 = vmul.f32 %v1959_v51, %v277_v41 }
  0x4b   : > { %v280_v48 = vmul.f32 %v1964_v54, %v277_v41  ;;  %v281_v49 = vmul.f32 %v1974_v61, %v277_v41  ;;  %v293_v4 = vmul.f32 %v1852_v10, %v292_v42  ;;  %v282_v7 = vadd.f32 %v278_v3, %v272_v40 }
  0x4c   : > { %v294_v52 = vmul.f32 %v1860_v15, %v292_v42  ;;  %v295_v53 = vmul.f32 %v1865_v19, %v292_v42  ;;  %v296_v9 = vmul.f32 %v1867_v23, %v292_v42  ;;  %v283_v55 = vadd.f32 %v279_v47, %v273_v43 }
  0x4d   : > { %v284_v57 = vadd.f32 %v280_v48, %v274_v44  ;;  %v285_v58 = vadd.f32 %v281_v49, %v275_v45  ;;  %v298_v59 = vadd.f32 %v297_v2, %v293_v4  ;;  %1573 = vtanh.f32 %v282_v7 }
  0x4e   : > { %v2009_v62 = vpop.eup %1565  ;;  %v299_v63 = vadd.f32 %v297_v2, %v294_v52  ;;  %v300_v5 = vadd.f32 %v297_v2, %v295_v53  ;;  %v301_v6 = vadd.f32 %v297_v2, %v296_v9  ;;  %1575 = vtanh.f32 %v283_v55 }
  0x4f   : > { %v2011_v11 = vpop.eup %1567  ;;  %v303_v12 = vstv %s1984_s29  ;;  %v313_v13 = vstv %s1987_s30  ;;  %v323_v14 = vstv %s1989_s4  ;;  %1577 = vtanh.f32 %v284_v57  ;;  %s2178_s29 = sld [smem:[#allocation2 + $0x35]]  ;;  %s2196_s30 = sld [smem:[#allocation2 + $0x36]] }
  0x50   : > { %v2016_v17 = vpop.eup %1569  ;;  %v304_v18 = vmul.f32 %v1878_v30, %v303_v12  ;;  %v305_v20 = vmul.f32 %v1882_v35, %v303_v12  ;;  %v306_v21 = vmul.f32 %v1886_v39, %v303_v12  ;;  %1579 = vtanh.f32 %v285_v58  ;;  %s2198_s4 = sld [smem:[#allocation2 + $0x37]] }
  0x51   : > { %v2021_v24 = vpop.eup %1571  ;;  %v307_v25 = vmul.f32 %v1890_v1, %v303_v12  ;;  %v314_v26 = vmul.f32 %v1904_v50, %v313_v13  ;;  %v315_v29 = vmul.f32 %v1907_v8, %v313_v13  ;;  %v316_v33 = vmul.f32 %v1916_v56, %v313_v13 }
  0x52   : > { %v308_v27 = vadd.f32 %v304_v18, %v298_v59  ;;  %v309_v31 = vadd.f32 %v305_v20, %v299_v63  ;;  %v310_v32 = vadd.f32 %v306_v21, %v300_v5  ;;  %v317_v37 = vmul.f32 %v1918_v60, %v313_v13 }
  0x53   : > { %v311_v36 = vadd.f32 %v307_v25, %v301_v6  ;;  %v324_v0 = vmul.f32 %v1930_v16, %v323_v14  ;;  %v325_v38 = vmul.f32 %v1934_v22, %v323_v14  ;;  %v326_v2 = vmul.f32 %v1939_v28, %v323_v14 }
  0x54   : > { %v318_v40 = vadd.f32 %v314_v26, %v308_v27  ;;  %v319_v41 = vadd.f32 %v315_v29, %v309_v31  ;;  %v320_v42 = vadd.f32 %v316_v33, %v310_v32  ;;  %v327_v44 = vmul.f32 %v1943_v34, %v323_v14 }
  0x55   : > { %v321_v43 = vadd.f32 %v317_v37, %v311_v36  ;;  %v333_v45 = vstv %s2005_s5  ;;  %v348_v3 = vstv %s2007_s6  ;;  %v353_v20 = vstv %s2026_s7  ;;  %s2208_s5 = sld [smem:[#allocation2 + $0x48]]  ;;  %s2215_s7 = sld [smem:[#allocation2 + $0x39]] }
  0x56   : > { %v328_v47 = vadd.f32 %v324_v0, %v318_v40  ;;  %v329_v48 = vadd.f32 %v325_v38, %v319_v41  ;;  %v330_v49 = vadd.f32 %v326_v2, %v320_v42  ;;  %v334_v4 = vmul.f32 %v1955_v46, %v333_v45  ;;  %s2213_s6 = sld [smem:[#allocation2 + $0x38]] }
  0x57   : > { %v331_v7 = vadd.f32 %v327_v44, %v321_v43  ;;  %v335_v52 = vmul.f32 %v1959_v51, %v333_v45  ;;  %v336_v53 = vmul.f32 %v1964_v54, %v333_v45  ;;  %v337_v9 = vmul.f32 %v1974_v61, %v333_v45  ;;  %v2046_v55 = vpop.eup %1573 }
  0x58   : > { %v338_v57 = vadd.f32 %v334_v4, %v328_v47  ;;  %v349_v58 = vmul.f32 %v1852_v10, %v348_v3  ;;  %v350_v59 = vmul.f32 %v1860_v15, %v348_v3  ;;  %v351_v63 = vmul.f32 %v1865_v19, %v348_v3  ;;  %v2051_v5 = vpop.eup %1575 }
  0x59   : > { %v339_v6 = vadd.f32 %v335_v52, %v329_v48  ;;  %v340_v12 = vadd.f32 %v336_v53, %v330_v49  ;;  %v341_v13 = vadd.f32 %v337_v9, %v331_v7  ;;  %v352_v14 = vmul.f32 %v1867_v23, %v348_v3  ;;  %v2054_v18 = vpop.eup %1577 }
  0x5a   : > { %1581 = vtanh.f32 %v338_v57  ;;  %v359_v21 = vstv %s2029_s8  ;;  %v369_v25 = vstv %s2031_s9  ;;  %v2063_v26 = vpop.eup %1579  ;;  %v354_v29 = vadd.f32 %v353_v20, %v349_v58  ;;  %s2228_s8 = sld [smem:[#allocation2 + $0x3a]]  ;;  %s2239_s9 = sld [smem:[#allocation2 + $0x3b]] }
  0x5b   : > { %1583 = vtanh.f32 %v339_v6  ;;  %v355_v27 = vadd.f32 %v353_v20, %v350_v59  ;;  %v356_v31 = vadd.f32 %v353_v20, %v351_v63  ;;  %v357_v32 = vadd.f32 %v353_v20, %v352_v14 }
  0x5c   : > { %1585 = vtanh.f32 %v340_v12  ;;  %v360_v33 = vmul.f32 %v1878_v30, %v359_v21  ;;  %v361_v36 = vmul.f32 %v1882_v35, %v359_v21  ;;  %v362_v37 = vmul.f32 %v1886_v39, %v359_v21 }
  0x5d   : > { %1587 = vtanh.f32 %v341_v13  ;;  %v363_v0 = vmul.f32 %v1890_v1, %v359_v21  ;;  %v370_v38 = vmul.f32 %v1904_v50, %v369_v25  ;;  %v371_v42 = vmul.f32 %v1907_v8, %v369_v25 }
  0x5e   : > { %v364_v40 = vadd.f32 %v360_v33, %v354_v29  ;;  %v365_v41 = vadd.f32 %v361_v36, %v355_v27  ;;  %v372_v2 = vmul.f32 %v1916_v56, %v369_v25  ;;  %v366_v43 = vadd.f32 %v362_v37, %v356_v31 }
  0x5f   : > { %v367_v44 = vadd.f32 %v363_v0, %v357_v32  ;;  %v373_v45 = vmul.f32 %v1918_v60, %v369_v25  ;;  %v379_v3 = vstv %s2044_s10  ;;  %v389_v59 = vstv %s2059_s11  ;;  %s2241_s10 = sld [smem:[#allocation2 + $0x3c]]  ;;  %s2256_s11 = sld [smem:[#allocation2 + $0x49]] }
  0x60   : > { %v374_v47 = vadd.f32 %v370_v38, %v364_v40  ;;  %v375_v48 = vadd.f32 %v371_v42, %v365_v41  ;;  %v380_v49 = vmul.f32 %v1930_v16, %v379_v3  ;;  %v381_v4 = vmul.f32 %v1934_v22, %v379_v3 }
  0x61   : > { %v376_v7 = vadd.f32 %v372_v2, %v366_v43  ;;  %v377_v52 = vadd.f32 %v373_v45, %v367_v44  ;;  %v382_v53 = vmul.f32 %v1939_v28, %v379_v3  ;;  %v383_v9 = vmul.f32 %v1943_v34, %v379_v3 }
  0x62   : > { %v384_v57 = vadd.f32 %v380_v49, %v374_v47  ;;  %v385_v58 = vadd.f32 %v381_v4, %v375_v48  ;;  %v404_v63 = vstv %s2061_s12  ;;  %v390_v13 = vmul.f32 %v1955_v46, %v389_v59  ;;  %s2258_s12 = sld [smem:[#allocation2 + $0x3d]] }
  0x63   : > { %v386_v6 = vadd.f32 %v382_v53, %v376_v7  ;;  %v387_v12 = vadd.f32 %v383_v9, %v377_v52  ;;  %v391_v14 = vmul.f32 %v1959_v51, %v389_v59  ;;  %v392_v21 = vmul.f32 %v1964_v54, %v389_v59 }
  0x64   : > { %v2088_v20 = vpop.eup %1581  ;;  %v393_v25 = vmul.f32 %v1974_v61, %v389_v59  ;;  %v405_v29 = vmul.f32 %v1852_v10, %v404_v63  ;;  %v406_v27 = vmul.f32 %v1860_v15, %v404_v63  ;;  %v394_v32 = vadd.f32 %v390_v13, %v384_v57 }
  0x65   : > { %v2098_v31 = vpop.eup %1583  ;;  %v395_v33 = vadd.f32 %v391_v14, %v385_v58  ;;  %v407_v36 = vmul.f32 %v1865_v19, %v404_v63  ;;  %v408_v37 = vmul.f32 %v1867_v23, %v404_v63  ;;  %v396_v38 = vadd.f32 %v392_v21, %v386_v6 }
  0x66   : > { %v2102_v0 = vpop.eup %1585  ;;  %v397_v40 = vadd.f32 %v393_v25, %v387_v12  ;;  %v409_v10 = vstv %s2072_s13  ;;  %v415_v41 = vstv %s2074_s14  ;;  %1589 = vtanh.f32 %v394_v32  ;;  %s2266_s13 = sld [smem:[#allocation2 + $0x3e]]  ;;  %s2278_s14 = sld [smem:[#allocation2 + $0x3f]] }
  0x67   : > { %v2106_v15 = vpop.eup %1587  ;;  %v410_v42 = vadd.f32 %v409_v10, %v405_v29  ;;  %v411_v2 = vadd.f32 %v409_v10, %v406_v27  ;;  %v412_v43 = vadd.f32 %v409_v10, %v407_v36  ;;  %1591 = vtanh.f32 %v395_v33 }
  0x68   : > { %v413_v44 = vadd.f32 %v409_v10, %v408_v37  ;;  %v416_v45 = vmul.f32 %v1878_v30, %v415_v41  ;;  %v417_v19 = vmul.f32 %v1882_v35, %v415_v41  ;;  %1593 = vtanh.f32 %v396_v38 }
  0x69   : > { %v418_v23 = vmul.f32 %v1886_v39, %v415_v41  ;;  %v419_v3 = vmul.f32 %v1890_v1, %v415_v41  ;;  %v425_v47 = vstv %s2082_s15  ;;  %1595 = vtanh.f32 %v397_v40  ;;  %s2280_s15 = sld [smem:[#allocation2 + $0x40]] }
  0x6a   : > { %v420_v48 = vadd.f32 %v416_v45, %v410_v42  ;;  %v421_v49 = vadd.f32 %v417_v19, %v411_v2  ;;  %v426_v4 = vmul.f32 %v1904_v50, %v425_v47  ;;  %v427_v35 = vmul.f32 %v1907_v8, %v425_v47 }
  0x6b   : > { %v422_v30 = vadd.f32 %v418_v23, %v412_v43  ;;  %v423_v7 = vadd.f32 %v419_v3, %v413_v44  ;;  %v428_v52 = vmul.f32 %v1916_v56, %v425_v47  ;;  %v429_v39 = vmul.f32 %v1918_v60, %v425_v47 }
  0x6c   : > { %v430_v1 = vadd.f32 %v426_v4, %v420_v48  ;;  %v435_v53 = vstv %s2094_s16  ;;  %v445_v9 = vstv %s2096_s0  ;;  %v431_v57 = vadd.f32 %v427_v35, %v421_v49  ;;  %s2294_s16 = sld [smem:[#allocation2 + $0x41]]  ;;  %s2300_s0 = sld [smem:[#allocation2 + $0x4a]] }
  0x6d   : > { %v432_v50 = vadd.f32 %v428_v52, %v422_v30  ;;  %v436_v58 = vmul.f32 %v1930_v16, %v435_v53  ;;  %v437_v59 = vmul.f32 %v1934_v22, %v435_v53  ;;  %v433_v63 = vadd.f32 %v429_v39, %v423_v7 }
  0x6e   : > { %v438_v8 = vmul.f32 %v1939_v28, %v435_v53  ;;  %v439_v56 = vmul.f32 %v1943_v34, %v435_v53  ;;  %v446_v6 = vmul.f32 %v1955_v46, %v445_v9  ;;  %v447_v60 = vmul.f32 %v1959_v51, %v445_v9 }
  0x6f   : > { %v440_v12 = vadd.f32 %v436_v58, %v430_v1  ;;  %v441_v13 = vadd.f32 %v437_v59, %v431_v57  ;;  %v448_v14 = vmul.f32 %v1964_v54, %v445_v9  ;;  %v449_v16 = vmul.f32 %v1974_v61, %v445_v9 }
  0x70   : > { %v442_v21 = vadd.f32 %v438_v8, %v432_v50  ;;  %v443_v25 = vadd.f32 %v439_v56, %v433_v63  ;;  %v460_v22 = vstv %s2110_s18  ;;  %v2138_v28 = vpop.eup %1589  ;;  %v465_v37 = vstv %s2116_s19  ;;  %s2304_s18 = sld [smem:[#allocation2 + $0x42]]  ;;  %s2306_s19 = sld [smem:[#allocation2 + $0x43]] }
  0x71   : > { %v450_v34 = vadd.f32 %v446_v6, %v440_v12  ;;  %v451_v46 = vadd.f32 %v447_v60, %v441_v13  ;;  %v461_v29 = vmul.f32 %v2009_v62, %v460_v22  ;;  %v462_v51 = vmul.f32 %v2011_v11, %v460_v22  ;;  %v2142_v27 = vpop.eup %1591 }
  0x72   : > { %v452_v54 = vadd.f32 %v448_v14, %v442_v21  ;;  %v453_v32 = vadd.f32 %v449_v16, %v443_v25  ;;  %v463_v33 = vmul.f32 %v2016_v17, %v460_v22  ;;  %v464_v61 = vmul.f32 %v2021_v24, %v460_v22  ;;  %v2146_v36 = vpop.eup %1593 }
  0x73   : > { %1597 = vtanh.f32 %v450_v34  ;;  %v471_v38 = vstv %s2120_s20  ;;  %v481_v40 = vstv %s2122_s21  ;;  %v2155_v10 = vpop.eup %1595  ;;  %v466_v41 = vadd.f32 %v465_v37, %v461_v29  ;;  %s2320_s20 = sld [smem:[#allocation2 + $0x44]]  ;;  %s2335_s21 = sld [smem:[#allocation2 + $0x45]] }
  0x74   : > { %1599 = vtanh.f32 %v451_v46  ;;  %v467_v42 = vadd.f32 %v465_v37, %v462_v51  ;;  %v468_v2 = vadd.f32 %v465_v37, %v463_v33  ;;  %v469_v43 = vadd.f32 %v465_v37, %v464_v61 }
  0x75   : > { %1601 = vtanh.f32 %v452_v54  ;;  %v472_v44 = vmul.f32 %v2046_v55, %v471_v38  ;;  %v473_v45 = vmul.f32 %v2051_v5, %v471_v38  ;;  %v474_v19 = vmul.f32 %v2054_v18, %v471_v38 }
  0x76   : > { %1603 = vtanh.f32 %v453_v32  ;;  %v475_v23 = vmul.f32 %v2063_v26, %v471_v38  ;;  %v482_v3 = vmul.f32 %v2088_v20, %v481_v40  ;;  %v483_v49 = vmul.f32 %v2098_v31, %v481_v40 }
  0x77   : > { %v476_v47 = vadd.f32 %v472_v44, %v466_v41  ;;  %v477_v48 = vadd.f32 %v473_v45, %v467_v42  ;;  %v484_v4 = vmul.f32 %v2102_v0, %v481_v40  ;;  %v478_v30 = vadd.f32 %v474_v19, %v468_v2 }
  0x78   : > { %v479_v7 = vadd.f32 %v475_v23, %v469_v43  ;;  %v485_v35 = vmul.f32 %v2106_v15, %v481_v40  ;;  %v491_v52 = vstv %s2136_s22  ;;  %v501_v56 = vstv %s2151_s24  ;;  %s2337_s22 = sld [smem:[#allocation2 + $0x4b]]  ;;  %s2348_s24 = sld [smem:[#allocation2 + $0x64]] }
  0x79   : > { %v486_v39 = vadd.f32 %v482_v3, %v476_v47  ;;  %v487_v1 = vadd.f32 %v483_v49, %v477_v48  ;;  %v492_v53 = vmul.f32 %v2138_v28, %v491_v52  ;;  %v493_v9 = vmul.f32 %v2142_v27, %v491_v52 }
  0x7a   : > { %v488_v57 = vadd.f32 %v484_v4, %v478_v30  ;;  %v489_v50 = vadd.f32 %v485_v35, %v479_v7  ;;  %v494_v58 = vmul.f32 %v2146_v36, %v491_v52  ;;  %v495_v59 = vmul.f32 %v2155_v10, %v491_v52 }
  0x7b   : > { %v496_v63 = vadd.f32 %v492_v53, %v486_v39  ;;  %v497_v8 = vadd.f32 %v493_v9, %v487_v1  ;;  %v516_v6 = vstv %s2153_s25  ;;  %v521_v22 = vstv %s2159_s26  ;;  %s2350_s25 = sld [smem:[#allocation2 + $0x4c]]  ;;  %s2358_s26 = sld [smem:[#allocation2 + $0x4d]] }
  0x7c   : > { %v498_v12 = vadd.f32 %v494_v58, %v488_v57  ;;  %v499_v13 = vadd.f32 %v495_v59, %v489_v50  ;;  %v517_v60 = vmul.f32 %v2009_v62, %v516_v6  ;;  %v518_v14 = vmul.f32 %v2011_v11, %v516_v6 }
  0x7d   : > { %v2182_v21 = vpop.eup %1597  ;;  %v519_v25 = vmul.f32 %v2016_v17, %v516_v6  ;;  %v520_v16 = vmul.f32 %v2021_v24, %v516_v6  ;;  %v527_v34 = vstv %s2161_s27  ;;  %v537_v30 = vstv %s2176_s28  ;;  %s2370_s27 = sld [smem:[#allocation2 + $0x4e]]  ;;  %s2372_s28 = sld [smem:[#allocation2 + $0x4f]] }
  0x7e   : > { %v2188_v46 = vpop.eup %1599  ;;  %v502_v29 = vmul.f32 %v2182_v21, %v501_v56  ;;  %v522_v51 = vadd.f32 %v521_v22, %v517_v60  ;;  %v523_v54 = vadd.f32 %v521_v22, %v518_v14  ;;  %v528_v32 = vmul.f32 %v2046_v55, %v527_v34 }
  0x7f   : > { %v2192_v33 = vpop.eup %1601  ;;  %v503_v61 = vmul.f32 %v2188_v46, %v501_v56  ;;  %v524_v37 = vadd.f32 %v521_v22, %v519_v25  ;;  %v525_v38 = vadd.f32 %v521_v22, %v520_v16  ;;  %v529_v40 = vmul.f32 %v2051_v5, %v527_v34 }
  0x80   : > { %v2200_v41 = vpop.eup %1603  ;;  %v504_v42 = vmul.f32 %v2192_v33, %v501_v56  ;;  %v506_v2 = vadd.f32 %v502_v29, %v496_v63  ;;  %v530_v43 = vmul.f32 %v2054_v18, %v527_v34  ;;  %v531_v44 = vmul.f32 %v2063_v26, %v527_v34 }
  0x81   : > { %v505_v45 = vmul.f32 %v2200_v41, %v501_v56  ;;  %v507_v19 = vadd.f32 %v503_v61, %v497_v8  ;;  %v532_v23 = vadd.f32 %v528_v32, %v522_v51  ;;  %v533_v3 = vadd.f32 %v529_v40, %v523_v54 }
  0x82   : > { %v508_v47 = vadd.f32 %v504_v42, %v498_v12  ;;  %1605 = vtanh.f32 %v506_v2  ;;  %v534_v48 = vadd.f32 %v530_v43, %v524_v37  ;;  %v535_v49 = vadd.f32 %v531_v44, %v525_v38 }
  0x83   : > { %v509_v4 = vadd.f32 %v505_v45, %v499_v13  ;;  %1607 = vtanh.f32 %v507_v19  ;;  %v547_v7 = vstv %s2178_s29  ;;  %v538_v35 = vmul.f32 %v2088_v20, %v537_v30  ;;  %s2382_s29 = sld [smem:[#allocation2 + $0x50]] }
  0x84   : > { %1609 = vtanh.f32 %v508_v47  ;;  %v539_v52 = vmul.f32 %v2098_v31, %v537_v30  ;;  %v540_v39 = vmul.f32 %v2102_v0, %v537_v30  ;;  %v541_v1 = vmul.f32 %v2106_v15, %v537_v30 }
  0x85   : > { %1611 = vtanh.f32 %v509_v4  ;;  %v548_v53 = vmul.f32 %v2138_v28, %v547_v7  ;;  %v549_v9 = vmul.f32 %v2142_v27, %v547_v7  ;;  %v542_v57 = vadd.f32 %v538_v35, %v532_v23 }
  0x86   : > { %v543_v50 = vadd.f32 %v539_v52, %v533_v3  ;;  %v544_v58 = vadd.f32 %v540_v39, %v534_v48  ;;  %v550_v59 = vmul.f32 %v2146_v36, %v547_v7  ;;  %v545_v63 = vadd.f32 %v541_v1, %v535_v49 }
  0x87   : > { %v551_v8 = vmul.f32 %v2155_v10, %v547_v7  ;;  %v557_v56 = vstv %s2196_s30  ;;  %v572_v6 = vstv %s2198_s4  ;;  %v552_v12 = vadd.f32 %v548_v53, %v542_v57  ;;  %s2388_s30 = sld [smem:[#allocation2 + $0x65]]  ;;  %s2390_s4 = sld [smem:[#allocation2 + $0x51]] }
  0x88   : > { %v553_v13 = vadd.f32 %v549_v9, %v543_v50  ;;  %v554_v60 = vadd.f32 %v550_v59, %v544_v58  ;;  %v558_v14 = vmul.f32 %v2182_v21, %v557_v56  ;;  %v559_v16 = vmul.f32 %v2188_v46, %v557_v56 }
  0x89   : > { %v555_v25 = vadd.f32 %v551_v8, %v545_v63  ;;  %v560_v22 = vmul.f32 %v2192_v33, %v557_v56  ;;  %v561_v34 = vmul.f32 %v2200_v41, %v557_v56  ;;  %v573_v51 = vmul.f32 %v2009_v62, %v572_v6 }
  0x8a   : > { %v562_v29 = vadd.f32 %v558_v14, %v552_v12  ;;  %v574_v54 = vmul.f32 %v2011_v11, %v572_v6  ;;  %v575_v32 = vmul.f32 %v2016_v17, %v572_v6  ;;  %v563_v61 = vadd.f32 %v559_v16, %v553_v13 }
  0x8b   : > { %v564_v37 = vadd.f32 %v560_v22, %v554_v60  ;;  %v565_v38 = vadd.f32 %v561_v34, %v555_v25  ;;  %v576_v40 = vmul.f32 %v2021_v24, %v572_v6  ;;  %v577_v2 = vstv %s2208_s5  ;;  %s2395_s5 = sld [smem:[#allocation2 + $0x52]] }
  0x8c   : > { %v2234_v42 = vpop.eup %1605  ;;  %1613 = vtanh.f32 %v562_v29  ;;  %v583_v43 = vstv %s2213_s6  ;;  %v593_v44 = vstv %s2215_s7  ;;  %v578_v19 = vadd.f32 %v577_v2, %v573_v51  ;;  %s2397_s6 = sld [smem:[#allocation2 + $0x53]]  ;;  %s2428_s7 = sld [smem:[#allocation2 + $0x54]] }
  0x8d   : > { %v2243_v45 = vpop.eup %1607  ;;  %1615 = vtanh.f32 %v563_v61  ;;  %v579_v23 = vadd.f32 %v577_v2, %v574_v54  ;;  %v580_v3 = vadd.f32 %v577_v2, %v575_v32  ;;  %v581_v48 = vadd.f32 %v577_v2, %v576_v40 }
  0x8e   : > { %v2245_v47 = vpop.eup %1609  ;;  %1617 = vtanh.f32 %v564_v37  ;;  %v584_v49 = vmul.f32 %v2046_v55, %v583_v43  ;;  %v585_v4 = vmul.f32 %v2051_v5, %v583_v43  ;;  %v586_v7 = vmul.f32 %v2054_v18, %v583_v43 }
  0x8f   : > { %v2249_v30 = vpop.eup %1611  ;;  %1619 = vtanh.f32 %v565_v38  ;;  %v587_v35 = vmul.f32 %v2063_v26, %v583_v43  ;;  %v594_v52 = vmul.f32 %v2088_v20, %v593_v44  ;;  %v595_v53 = vmul.f32 %v2098_v31, %v593_v44 }
  0x90   : > { %v588_v39 = vadd.f32 %v584_v49, %v578_v19  ;;  %v589_v1 = vadd.f32 %v585_v4, %v579_v23  ;;  %v596_v9 = vmul.f32 %v2102_v0, %v593_v44  ;;  %v590_v57 = vadd.f32 %v586_v7, %v580_v3 }
  0x91   : > { %v591_v50 = vadd.f32 %v587_v35, %v581_v48  ;;  %v597_v58 = vmul.f32 %v2106_v15, %v593_v44  ;;  %v603_v59 = vstv %s2228_s8  ;;  %v613_v22 = vstv %s2239_s9  ;;  %s2430_s8 = sld [smem:[#allocation2 + $0x55]]  ;;  %s2440_s9 = sld [smem:[#allocation2 + $0x66]] }
  0x92   : > { %v598_v63 = vadd.f32 %v594_v52, %v588_v39  ;;  %v599_v8 = vadd.f32 %v595_v53, %v589_v1  ;;  %v604_v56 = vmul.f32 %v2138_v28, %v603_v59  ;;  %v605_v6 = vmul.f32 %v2142_v27, %v603_v59 }
  0x93   : > { %v600_v12 = vadd.f32 %v596_v9, %v590_v57  ;;  %v601_v13 = vadd.f32 %v597_v58, %v591_v50  ;;  %v606_v60 = vmul.f32 %v2146_v36, %v603_v59  ;;  %v607_v14 = vmul.f32 %v2155_v10, %v603_v59 }
  0x94   : > { %v608_v25 = vadd.f32 %v604_v56, %v598_v63  ;;  %v609_v16 = vadd.f32 %v605_v6, %v599_v8  ;;  %v628_v34 = vstv %s2241_s10  ;;  %v614_v54 = vmul.f32 %v2182_v21, %v613_v22  ;;  %s2442_s10 = sld [smem:[#allocation2 + $0x56]] }
  0x95   : > { %v610_v29 = vadd.f32 %v606_v60, %v600_v12  ;;  %v611_v51 = vadd.f32 %v607_v14, %v601_v13  ;;  %v615_v32 = vmul.f32 %v2188_v46, %v613_v22  ;;  %v616_v37 = vmul.f32 %v2192_v33, %v613_v22 }
  0x96   : > { %v2272_v61 = vpop.eup %1613  ;;  %v617_v38 = vmul.f32 %v2200_v41, %v613_v22  ;;  %v629_v40 = vmul.f32 %v2009_v62, %v628_v34  ;;  %v630_v2 = vmul.f32 %v2011_v11, %v628_v34  ;;  %v618_v44 = vadd.f32 %v614_v54, %v608_v25 }
  0x97   : > { %v2282_v43 = vpop.eup %1615  ;;  %v619_v19 = vadd.f32 %v615_v32, %v609_v16  ;;  %v631_v23 = vmul.f32 %v2016_v17, %v628_v34  ;;  %v632_v3 = vmul.f32 %v2021_v24, %v628_v34  ;;  %v620_v49 = vadd.f32 %v616_v37, %v610_v29 }
  0x98   : > { %v2286_v48 = vpop.eup %1617  ;;  %v621_v4 = vadd.f32 %v617_v38, %v611_v51  ;;  %v633_v7 = vstv %s2256_s11  ;;  %v639_v35 = vstv %s2258_s12  ;;  %1621 = vtanh.f32 %v618_v44  ;;  %s2450_s11 = sld [smem:[#allocation2 + $0x57]]  ;;  %s2460_s12 = sld [smem:[#allocation2 + $0x58]] }
  0x99   : > { %v2290_v52 = vpop.eup %1619  ;;  %v634_v39 = vadd.f32 %v633_v7, %v629_v40  ;;  %v635_v1 = vadd.f32 %v633_v7, %v630_v2  ;;  %v636_v53 = vadd.f32 %v633_v7, %v631_v23  ;;  %1623 = vtanh.f32 %v619_v19 }
  0x9a   : > { %v637_v9 = vadd.f32 %v633_v7, %v632_v3  ;;  %v640_v57 = vmul.f32 %v2046_v55, %v639_v35  ;;  %v641_v50 = vmul.f32 %v2051_v5, %v639_v35  ;;  %1625 = vtanh.f32 %v620_v49 }
  0x9b   : > { %v642_v58 = vmul.f32 %v2054_v18, %v639_v35  ;;  %v643_v59 = vmul.f32 %v2063_v26, %v639_v35  ;;  %v649_v63 = vstv %s2266_s13  ;;  %1627 = vtanh.f32 %v621_v4  ;;  %s2462_s13 = sld [smem:[#allocation2 + $0x59]] }
  0x9c   : > { %v644_v8 = vadd.f32 %v640_v57, %v634_v39  ;;  %v645_v56 = vadd.f32 %v641_v50, %v635_v1  ;;  %v650_v6 = vmul.f32 %v2088_v20, %v649_v63  ;;  %v651_v60 = vmul.f32 %v2098_v31, %v649_v63 }
  0x9d   : > { %v646_v12 = vadd.f32 %v642_v58, %v636_v53  ;;  %v647_v13 = vadd.f32 %v643_v59, %v637_v9  ;;  %v652_v14 = vmul.f32 %v2102_v0, %v649_v63  ;;  %v653_v25 = vmul.f32 %v2106_v15, %v649_v63 }
  0x9e   : > { %v654_v16 = vadd.f32 %v650_v6, %v644_v8  ;;  %v659_v22 = vstv %s2278_s14  ;;  %v669_v34 = vstv %s2280_s15  ;;  %v655_v29 = vadd.f32 %v651_v60, %v645_v56  ;;  %s2474_s14 = sld [smem:[#allocation2 + $0x5a]]  ;;  %s2484_s15 = sld [smem:[#allocation2 + $0x67]] }
  0x9f   : > { %v656_v51 = vadd.f32 %v652_v14, %v646_v12  ;;  %v660_v54 = vmul.f32 %v2138_v28, %v659_v22  ;;  %v661_v32 = vmul.f32 %v2142_v27, %v659_v22  ;;  %v657_v37 = vadd.f32 %v653_v25, %v647_v13 }
  0xa0   : > { %v662_v38 = vmul.f32 %v2146_v36, %v659_v22  ;;  %v663_v40 = vmul.f32 %v2155_v10, %v659_v22  ;;  %v670_v2 = vmul.f32 %v2182_v21, %v669_v34  ;;  %v671_v23 = vmul.f32 %v2188_v46, %v669_v34 }
  0xa1   : > { %v664_v44 = vadd.f32 %v660_v54, %v654_v16  ;;  %v665_v19 = vadd.f32 %v661_v32, %v655_v29  ;;  %v672_v3 = vmul.f32 %v2192_v33, %v669_v34  ;;  %v673_v7 = vmul.f32 %v2200_v41, %v669_v34 }
  0xa2   : > { %v666_v49 = vadd.f32 %v662_v38, %v656_v51  ;;  %v667_v4 = vadd.f32 %v663_v40, %v657_v37  ;;  %v684_v35 = vstv %s2294_s16  ;;  %v2322_v39 = vpop.eup %1621  ;;  %v689_v6 = vstv %s2300_s0  ;;  %s2488_s16 = sld [smem:[#allocation2 + $0x5b]]  ;;  %s2490_s0 = sld [smem:[#allocation2 + $0x5c]] }
  0xa3   : > { %v674_v1 = vadd.f32 %v670_v2, %v664_v44  ;;  %v675_v53 = vadd.f32 %v671_v23, %v665_v19  ;;  %v685_v9 = vmul.f32 %v2009_v62, %v684_v35  ;;  %v686_v57 = vmul.f32 %v2011_v11, %v684_v35  ;;  %v2326_v50 = vpop.eup %1623 }
  0xa4   : > { %v676_v58 = vadd.f32 %v672_v3, %v666_v49  ;;  %v677_v59 = vadd.f32 %v673_v7, %v667_v4  ;;  %v687_v63 = vmul.f32 %v2016_v17, %v684_v35  ;;  %v688_v8 = vmul.f32 %v2021_v24, %v684_v35  ;;  %v2330_v56 = vpop.eup %1625 }
  0xa5   : > { %1629 = vtanh.f32 %v674_v1  ;;  %v695_v12 = vstv %s2304_s18  ;;  %v705_v13 = vstv %s2306_s19  ;;  %v2339_v62 = vpop.eup %1627  ;;  %v690_v11 = vadd.f32 %v689_v6, %v685_v9  ;;  %s2504_s18 = sld [smem:[#allocation2 + $0x5d]]  ;;  %s2519_s19 = sld [smem:[#allocation2 + $0x5e]] }
  0xa6   : > { %1631 = vtanh.f32 %v675_v53  ;;  %v691_v60 = vadd.f32 %v689_v6, %v686_v57  ;;  %v692_v14 = vadd.f32 %v689_v6, %v687_v63  ;;  %v693_v17 = vadd.f32 %v689_v6, %v688_v8 }
  0xa7   : > { %1633 = vtanh.f32 %v676_v58  ;;  %v696_v24 = vmul.f32 %v2046_v55, %v695_v12  ;;  %v697_v25 = vmul.f32 %v2051_v5, %v695_v12  ;;  %v698_v16 = vmul.f32 %v2054_v18, %v695_v12 }
  0xa8   : > { %1635 = vtanh.f32 %v677_v59  ;;  %v699_v22 = vmul.f32 %v2063_v26, %v695_v12  ;;  %v706_v34 = vmul.f32 %v2088_v20, %v705_v13  ;;  %v707_v54 = vmul.f32 %v2098_v31, %v705_v13 }
  0xa9   : > { %v700_v29 = vadd.f32 %v696_v24, %v690_v11  ;;  %v701_v51 = vadd.f32 %v697_v25, %v691_v60  ;;  %v708_v32 = vmul.f32 %v2102_v0, %v705_v13  ;;  %v702_v55 = vadd.f32 %v698_v16, %v692_v14 }
  0xaa   : > { %v703_v5 = vadd.f32 %v699_v22, %v693_v17  ;;  %v709_v18 = vmul.f32 %v2106_v15, %v705_v13  ;;  %v715_v37 = vstv %s2320_s20  ;;  %v725_v3 = vstv %s2335_s21  ;;  %s2521_s20 = sld [smem:[#allocation2 + $0x5f]]  ;;  %s2532_s21 = sld [smem:[#allocation2 + $0x68]] }
  0xab   : > { %v710_v26 = vadd.f32 %v706_v34, %v700_v29  ;;  %v711_v38 = vadd.f32 %v707_v54, %v701_v51  ;;  %v716_v20 = vmul.f32 %v2138_v28, %v715_v37  ;;  %v717_v40 = vmul.f32 %v2142_v27, %v715_v37 }
  0xac   : > { %v712_v31 = vadd.f32 %v708_v32, %v702_v55  ;;  %v713_v2 = vadd.f32 %v709_v18, %v703_v5  ;;  %v718_v0 = vmul.f32 %v2146_v36, %v715_v37  ;;  %v719_v44 = vmul.f32 %v2155_v10, %v715_v37 }
  0xad   : > { %v720_v19 = vadd.f32 %v716_v20, %v710_v26  ;;  %v721_v23 = vadd.f32 %v717_v40, %v711_v38  ;;  %v740_v49 = vstv %s2337_s22  ;;  %v726_v7 = vmul.f32 %v2182_v21, %v725_v3  ;;  %s2534_s22 = sld [smem:[#allocation2 + $0x60]] }
  0xae   : > { %v722_v15 = vadd.f32 %v718_v0, %v712_v31  ;;  %v723_v4 = vadd.f32 %v719_v44, %v713_v2  ;;  %v727_v28 = vmul.f32 %v2188_v46, %v725_v3  ;;  %v728_v36 = vmul.f32 %v2192_v33, %v725_v3 }
  0xaf   : > { %v2364_v27 = vpop.eup %1629  ;;  %v729_v10 = vmul.f32 %v2200_v41, %v725_v3  ;;  %v741_v35 = vmul.f32 %v2234_v42, %v740_v49  ;;  %v742_v1 = vmul.f32 %v2243_v45, %v740_v49  ;;  %v730_v21 = vadd.f32 %v726_v7, %v720_v19 }
  0xb0   : > { %v2374_v53 = vpop.eup %1631  ;;  %v731_v46 = vadd.f32 %v727_v28, %v721_v23  ;;  %v743_v9 = vmul.f32 %v2245_v47, %v740_v49  ;;  %v744_v57 = vmul.f32 %v2249_v30, %v740_v49  ;;  %v732_v33 = vadd.f32 %v728_v36, %v722_v15 }
  0xb1   : > { %v2378_v58 = vpop.eup %1633  ;;  %v733_v41 = vadd.f32 %v729_v10, %v723_v4  ;;  %v745_v59 = vstv %s2348_s24  ;;  %v751_v63 = vstv %s2350_s25  ;;  %1637 = vtanh.f32 %v730_v21  ;;  %s2542_s24 = sld [smem:[#allocation2 + $0x61]]  ;;  %s2554_s25 = sld [smem:[#allocation2 + $0x62]] }
  0xb2   : > { %v2384_v8 = vpop.eup %1635  ;;  %v746_v6 = vadd.f32 %v745_v59, %v741_v35  ;;  %v747_v12 = vadd.f32 %v745_v59, %v742_v1  ;;  %v748_v13 = vadd.f32 %v745_v59, %v743_v9  ;;  %1639 = vtanh.f32 %v731_v46 }
  0xb3   : > { %v749_v11 = vadd.f32 %v745_v59, %v744_v57  ;;  %v752_v60 = vmul.f32 %v2272_v61, %v751_v63  ;;  %v753_v14 = vmul.f32 %v2282_v43, %v751_v63  ;;  %1641 = vtanh.f32 %v732_v33 }
  0xb4   : > { %v754_v17 = vmul.f32 %v2286_v48, %v751_v63  ;;  %v755_v24 = vmul.f32 %v2290_v52, %v751_v63  ;;  %v761_v25 = vstv %s2358_s26  ;;  %1643 = vtanh.f32 %v733_v41  ;;  %s2556_s26 = sld [smem:[#allocation2 + $0x63]] }
  0xb5   : > { %v756_v16 = vadd.f32 %v752_v60, %v746_v6  ;;  %v757_v22 = vadd.f32 %v753_v14, %v747_v12  ;;  %v762_v34 = vmul.f32 %v2322_v39, %v761_v25  ;;  %v763_v54 = vmul.f32 %v2326_v50, %v761_v25 }
  0xb6   : > { %v758_v29 = vadd.f32 %v754_v17, %v748_v13  ;;  %v759_v51 = vadd.f32 %v755_v24, %v749_v11  ;;  %v764_v32 = vmul.f32 %v2330_v56, %v761_v25  ;;  %v765_v55 = vmul.f32 %v2339_v62, %v761_v25 }
  0xb7   : > { %v766_v5 = vadd.f32 %v762_v34, %v756_v16  ;;  %v771_v18 = vstv %s2370_s27  ;;  %v781_v37 = vstv %s2372_s28  ;;  %v767_v26 = vadd.f32 %v763_v54, %v757_v22  ;;  %s2570_s27 = sld [smem:[#allocation2 + $0x69]]  ;;  %s2576_s28 = sld [smem:[#allocation2 + $0x82]] }
  0xb8   : > { %v768_v38 = vadd.f32 %v764_v32, %v758_v29  ;;  %v772_v20 = vmul.f32 %v2364_v27, %v771_v18  ;;  %v773_v40 = vmul.f32 %v2374_v53, %v771_v18  ;;  %v769_v31 = vadd.f32 %v765_v55, %v759_v51 }
  0xb9   : > { %v774_v2 = vmul.f32 %v2378_v58, %v771_v18  ;;  %v775_v0 = vmul.f32 %v2384_v8, %v771_v18  ;;  %v796_v44 = vstv %s2382_s29  ;;  %v801_v10 = vstv %s2388_s30  ;;  %s2580_s29 = sld [smem:[#allocation2 + $0x6a]]  ;;  %s2582_s30 = sld [smem:[#allocation2 + $0x6b]] }
  0xba   : > { %v776_v19 = vadd.f32 %v772_v20, %v766_v5  ;;  %v777_v23 = vadd.f32 %v773_v40, %v767_v26  ;;  %v797_v3 = vmul.f32 %v2234_v42, %v796_v44  ;;  %v798_v49 = vmul.f32 %v2243_v45, %v796_v44 }
  0xbb   : > { %v778_v15 = vadd.f32 %v774_v2, %v768_v38  ;;  %v779_v4 = vadd.f32 %v775_v0, %v769_v31  ;;  %v799_v7 = vmul.f32 %v2245_v47, %v796_v44  ;;  %v800_v28 = vmul.f32 %v2249_v30, %v796_v44  ;;  %v2414_v36 = vpop.eup %1637 }
  0xbc   : > { %v807_v35 = vstv %s2390_s4  ;;  %v817_v1 = vstv %s2395_s5  ;;  %v827_v21 = vstv %s2397_s6  ;;  %v2420_v46 = vpop.eup %1639  ;;  %v782_v9 = vmul.f32 %v2414_v36, %v781_v37  ;;  %s2596_s4 = sld [smem:[#allocation2 + $0x6c]]  ;;  %s2611_s5 = sld [smem:[#allocation2 + $0x6d]] }
  0xbd   : > { %v802_v57 = vadd.f32 %v801_v10, %v797_v3  ;;  %v803_v33 = vadd.f32 %v801_v10, %v798_v49  ;;  %v804_v41 = vadd.f32 %v801_v10, %v799_v7  ;;  %v2423_v59 = vpop.eup %1641  ;;  %v783_v63 = vmul.f32 %v2420_v46, %v781_v37  ;;  %s2613_s6 = sld [smem:[#allocation2 + $0x6e]] }
  0xbe   : > { %v805_v6 = vadd.f32 %v801_v10, %v800_v28  ;;  %v808_v12 = vmul.f32 %v2272_v61, %v807_v35  ;;  %v809_v13 = vmul.f32 %v2282_v43, %v807_v35  ;;  %v2432_v11 = vpop.eup %1643  ;;  %v784_v60 = vmul.f32 %v2423_v59, %v781_v37 }
  0xbf   : > { %v786_v14 = vadd.f32 %v782_v9, %v776_v19  ;;  %v810_v17 = vmul.f32 %v2286_v48, %v807_v35  ;;  %v811_v24 = vmul.f32 %v2290_v52, %v807_v35  ;;  %v785_v25 = vmul.f32 %v2432_v11, %v781_v37 }
  0xc0   : > { %v787_v16 = vadd.f32 %v783_v63, %v777_v23  ;;  %v812_v22 = vadd.f32 %v808_v12, %v802_v57  ;;  %v813_v34 = vadd.f32 %v809_v13, %v803_v33  ;;  %v788_v29 = vadd.f32 %v784_v60, %v778_v15 }
  0xc1   : > { %1645 = vtanh.f32 %v786_v14  ;;  %v814_v51 = vadd.f32 %v810_v17, %v804_v41  ;;  %v815_v54 = vadd.f32 %v811_v24, %v805_v6  ;;  %v789_v32 = vadd.f32 %v785_v25, %v779_v4 }
  0xc2   : > { %1647 = vtanh.f32 %v787_v16  ;;  %v818_v55 = vmul.f32 %v2322_v39, %v817_v1  ;;  %v819_v5 = vmul.f32 %v2326_v50, %v817_v1  ;;  %v820_v18 = vmul.f32 %v2330_v56, %v817_v1 }
  0xc3   : > { %1649 = vtanh.f32 %v788_v29  ;;  %v821_v37 = vmul.f32 %v2339_v62, %v817_v1  ;;  %v828_v26 = vmul.f32 %v2364_v27, %v827_v21  ;;  %v829_v40 = vmul.f32 %v2374_v53, %v827_v21 }
  0xc4   : > { %1651 = vtanh.f32 %v789_v32  ;;  %v822_v38 = vadd.f32 %v818_v55, %v812_v22  ;;  %v823_v20 = vadd.f32 %v819_v5, %v813_v34  ;;  %v824_v31 = vadd.f32 %v820_v18, %v814_v51 }
  0xc5   : > { %v825_v2 = vadd.f32 %v821_v37, %v815_v54  ;;  %v830_v0 = vmul.f32 %v2378_v58, %v827_v21  ;;  %v831_v44 = vmul.f32 %v2384_v8, %v827_v21  ;;  %v837_v3 = vstv %s2428_s7  ;;  %s2619_s7 = sld [smem:[#allocation2 + $0x83]] }
  0xc6   : > { %v832_v19 = vadd.f32 %v828_v26, %v822_v38  ;;  %v833_v23 = vadd.f32 %v829_v40, %v823_v20  ;;  %v852_v49 = vstv %s2430_s8  ;;  %v838_v7 = vmul.f32 %v2414_v36, %v837_v3  ;;  %s2621_s8 = sld [smem:[#allocation2 + $0x6f]] }
  0xc7   : > { %v834_v15 = vadd.f32 %v830_v0, %v824_v31  ;;  %v835_v4 = vadd.f32 %v831_v44, %v825_v2  ;;  %v839_v28 = vmul.f32 %v2420_v46, %v837_v3  ;;  %v840_v10 = vmul.f32 %v2423_v59, %v837_v3 }
  0xc8   : > { %v841_v35 = vmul.f32 %v2432_v11, %v837_v3  ;;  %v853_v1 = vmul.f32 %v2234_v42, %v852_v49  ;;  %v854_v21 = vmul.f32 %v2243_v45, %v852_v49  ;;  %v842_v9 = vadd.f32 %v838_v7, %v832_v19 }
  0xc9   : > { %v843_v57 = vadd.f32 %v839_v28, %v833_v23  ;;  %v855_v33 = vmul.f32 %v2245_v47, %v852_v49  ;;  %v856_v41 = vmul.f32 %v2249_v30, %v852_v49  ;;  %v844_v63 = vadd.f32 %v840_v10, %v834_v15 }
  0xca   : > { %v845_v6 = vadd.f32 %v841_v35, %v835_v4  ;;  %v857_v12 = vstv %s2440_s9  ;;  %v863_v13 = vstv %s2442_s10  ;;  %1653 = vtanh.f32 %v842_v9  ;;  %s2636_s9 = sld [smem:[#allocation2 + $0x70]]  ;;  %s2638_s10 = sld [smem:[#allocation2 + $0x71]] }
  0xcb   : > { %v2468_v60 = vpop.eup %1645  ;;  %v858_v14 = vadd.f32 %v857_v12, %v853_v1  ;;  %v859_v17 = vadd.f32 %v857_v12, %v854_v21  ;;  %v860_v24 = vadd.f32 %v857_v12, %v855_v33  ;;  %1655 = vtanh.f32 %v843_v57 }
  0xcc   : > { %v2470_v25 = vpop.eup %1647  ;;  %v861_v16 = vadd.f32 %v857_v12, %v856_v41  ;;  %v864_v22 = vmul.f32 %v2272_v61, %v863_v13  ;;  %v865_v34 = vmul.f32 %v2282_v43, %v863_v13  ;;  %1657 = vtanh.f32 %v844_v63 }
  0xcd   : > { %v2476_v29 = vpop.eup %1649  ;;  %v866_v51 = vmul.f32 %v2286_v48, %v863_v13  ;;  %v867_v54 = vmul.f32 %v2290_v52, %v863_v13  ;;  %v873_v32 = vstv %s2450_s11  ;;  %1659 = vtanh.f32 %v845_v6  ;;  %s2656_s11 = sld [smem:[#allocation2 + $0x72]] }
  0xce   : > { %v2481_v55 = vpop.eup %1651  ;;  %v868_v5 = vadd.f32 %v864_v22, %v858_v14  ;;  %v869_v18 = vadd.f32 %v865_v34, %v859_v17  ;;  %v874_v37 = vmul.f32 %v2322_v39, %v873_v32  ;;  %v875_v20 = vmul.f32 %v2326_v50, %v873_v32 }
  0xcf   : > { %v870_v26 = vadd.f32 %v866_v51, %v860_v24  ;;  %v871_v38 = vadd.f32 %v867_v54, %v861_v16  ;;  %v876_v40 = vmul.f32 %v2330_v56, %v873_v32  ;;  %v877_v31 = vmul.f32 %v2339_v62, %v873_v32 }
  0xd0   : > { %v878_v2 = vadd.f32 %v874_v37, %v868_v5  ;;  %v883_v0 = vstv %s2460_s12  ;;  %v893_v44 = vstv %s2462_s13  ;;  %v879_v19 = vadd.f32 %v875_v20, %v869_v18  ;;  %s2658_s12 = sld [smem:[#allocation2 + $0x73]]  ;;  %s2668_s13 = sld [smem:[#allocation2 + $0x84]] }
  0xd1   : > { %v880_v23 = vadd.f32 %v876_v40, %v870_v26  ;;  %v884_v3 = vmul.f32 %v2364_v27, %v883_v0  ;;  %v885_v49 = vmul.f32 %v2374_v53, %v883_v0  ;;  %v881_v15 = vadd.f32 %v877_v31, %v871_v38 }
  0xd2   : > { %v886_v4 = vmul.f32 %v2378_v58, %v883_v0  ;;  %v887_v7 = vmul.f32 %v2384_v8, %v883_v0  ;;  %v894_v28 = vmul.f32 %v2414_v36, %v893_v44  ;;  %v895_v1 = vmul.f32 %v2420_v46, %v893_v44 }
  0xd3   : > { %v888_v10 = vadd.f32 %v884_v3, %v878_v2  ;;  %v889_v35 = vadd.f32 %v885_v49, %v879_v19  ;;  %v896_v21 = vmul.f32 %v2423_v59, %v893_v44  ;;  %v897_v33 = vmul.f32 %v2432_v11, %v893_v44 }
  0xd4   : > { %v890_v9 = vadd.f32 %v886_v4, %v880_v23  ;;  %v891_v57 = vadd.f32 %v887_v7, %v881_v15  ;;  %v908_v41 = vstv %s2474_s14  ;;  %v2506_v63 = vpop.eup %1653  ;;  %v913_v54 = vstv %s2484_s15  ;;  %s2673_s14 = sld [smem:[#allocation2 + $0x74]]  ;;  %s2675_s15 = sld [smem:[#allocation2 + $0x75]] }
  0xd5   : > { %v898_v6 = vadd.f32 %v894_v28, %v888_v10  ;;  %v899_v12 = vadd.f32 %v895_v1, %v889_v35  ;;  %v909_v13 = vmul.f32 %v2234_v42, %v908_v41  ;;  %v910_v14 = vmul.f32 %v2243_v45, %v908_v41  ;;  %v2510_v17 = vpop.eup %1655 }
  0xd6   : > { %v900_v24 = vadd.f32 %v896_v21, %v890_v9  ;;  %v901_v16 = vadd.f32 %v897_v33, %v891_v57  ;;  %v911_v22 = vmul.f32 %v2245_v47, %v908_v41  ;;  %v912_v34 = vmul.f32 %v2249_v30, %v908_v41  ;;  %v2514_v51 = vpop.eup %1657 }
  0xd7   : > { %1661 = vtanh.f32 %v898_v6  ;;  %v919_v32 = vstv %s2488_s16  ;;  %v929_v5 = vstv %s2490_s0  ;;  %v2523_v18 = vpop.eup %1659  ;;  %v914_v37 = vadd.f32 %v913_v54, %v909_v13  ;;  %s2688_s16 = sld [smem:[#allocation2 + $0x76]]  ;;  %s2699_s0 = sld [smem:[#allocation2 + $0x77]] }
  0xd8   : > { %1663 = vtanh.f32 %v899_v12  ;;  %v915_v26 = vadd.f32 %v913_v54, %v910_v14  ;;  %v916_v38 = vadd.f32 %v913_v54, %v911_v22  ;;  %v917_v20 = vadd.f32 %v913_v54, %v912_v34 }
  0xd9   : > { %1665 = vtanh.f32 %v900_v24  ;;  %v920_v40 = vmul.f32 %v2272_v61, %v919_v32  ;;  %v921_v31 = vmul.f32 %v2282_v43, %v919_v32  ;;  %v922_v2 = vmul.f32 %v2286_v48, %v919_v32 }
  0xda   : > { %1667 = vtanh.f32 %v901_v16  ;;  %v923_v0 = vmul.f32 %v2290_v52, %v919_v32  ;;  %v930_v44 = vmul.f32 %v2322_v39, %v929_v5  ;;  %v931_v3 = vmul.f32 %v2326_v50, %v929_v5 }
  0xdb   : > { %v924_v19 = vadd.f32 %v920_v40, %v914_v37  ;;  %v925_v23 = vadd.f32 %v921_v31, %v915_v26  ;;  %v932_v49 = vmul.f32 %v2330_v56, %v929_v5  ;;  %v926_v15 = vadd.f32 %v922_v2, %v916_v38 }
  0xdc   : > { %v927_v4 = vadd.f32 %v923_v0, %v917_v20  ;;  %v933_v7 = vmul.f32 %v2339_v62, %v929_v5  ;;  %v939_v28 = vstv %s2504_s18  ;;  %v949_v13 = vstv %s2519_s19  ;;  %s2701_s18 = sld [smem:[#allocation2 + $0x78]]  ;;  %s2716_s19 = sld [smem:[#allocation2 + $0x85]] }
  0xdd   : > { %v934_v10 = vadd.f32 %v930_v44, %v924_v19  ;;  %v935_v35 = vadd.f32 %v931_v3, %v925_v23  ;;  %v940_v1 = vmul.f32 %v2364_v27, %v939_v28  ;;  %v941_v21 = vmul.f32 %v2374_v53, %v939_v28 }
  0xde   : > { %v936_v9 = vadd.f32 %v932_v49, %v926_v15  ;;  %v937_v57 = vadd.f32 %v933_v7, %v927_v4  ;;  %v942_v33 = vmul.f32 %v2378_v58, %v939_v28  ;;  %v943_v41 = vmul.f32 %v2384_v8, %v939_v28 }
  0xdf   : > { %v944_v6 = vadd.f32 %v940_v1, %v934_v10  ;;  %v945_v12 = vadd.f32 %v941_v21, %v935_v35  ;;  %v964_v14 = vstv %s2521_s20  ;;  %v950_v22 = vmul.f32 %v2414_v36, %v949_v13  ;;  %s2718_s20 = sld [smem:[#allocation2 + $0x79]] }
  0xe0   : > { %v946_v24 = vadd.f32 %v942_v33, %v936_v9  ;;  %v947_v16 = vadd.f32 %v943_v41, %v937_v57  ;;  %v951_v34 = vmul.f32 %v2420_v46, %v949_v13  ;;  %v952_v32 = vmul.f32 %v2423_v59, %v949_v13 }
  0xe1   : > { %v2548_v54 = vpop.eup %1661  ;;  %v953_v5 = vmul.f32 %v2432_v11, %v949_v13  ;;  %v965_v37 = vmul.f32 %v2234_v42, %v964_v14  ;;  %v966_v26 = vmul.f32 %v2243_v45, %v964_v14  ;;  %v954_v20 = vadd.f32 %v950_v22, %v944_v6 }
  0xe2   : > { %v2558_v38 = vpop.eup %1663  ;;  %v955_v40 = vadd.f32 %v951_v34, %v945_v12  ;;  %v967_v31 = vmul.f32 %v2245_v47, %v964_v14  ;;  %v968_v2 = vmul.f32 %v2249_v30, %v964_v14  ;;  %v956_v44 = vadd.f32 %v952_v32, %v946_v24 }
  0xe3   : > { %v2562_v0 = vpop.eup %1665  ;;  %v957_v19 = vadd.f32 %v953_v5, %v947_v16  ;;  %v969_v42 = vstv %s2532_s21  ;;  %v975_v23 = vstv %s2534_s22  ;;  %1669 = vtanh.f32 %v954_v20  ;;  %s2726_s21 = sld [smem:[#allocation2 + $0x7a]]  ;;  %s2738_s22 = sld [smem:[#allocation2 + $0x7b]] }
  0xe4   : > { %v2566_v45 = vpop.eup %1667  ;;  %v970_v3 = vadd.f32 %v969_v42, %v965_v37  ;;  %v971_v49 = vadd.f32 %v969_v42, %v966_v26  ;;  %v972_v15 = vadd.f32 %v969_v42, %v967_v31  ;;  %1671 = vtanh.f32 %v955_v40 }
  0xe5   : > { %v973_v4 = vadd.f32 %v969_v42, %v968_v2  ;;  %v976_v7 = vmul.f32 %v2272_v61, %v975_v23  ;;  %v977_v47 = vmul.f32 %v2282_v43, %v975_v23  ;;  %1673 = vtanh.f32 %v956_v44 }
  0xe6   : > { %v978_v30 = vmul.f32 %v2286_v48, %v975_v23  ;;  %v979_v28 = vmul.f32 %v2290_v52, %v975_v23  ;;  %v985_v10 = vstv %s2542_s24  ;;  %1675 = vtanh.f32 %v957_v19  ;;  %s2740_s24 = sld [smem:[#allocation2 + $0x7c]] }
  0xe7   : > { %v980_v35 = vadd.f32 %v976_v7, %v970_v3  ;;  %v981_v1 = vadd.f32 %v977_v47, %v971_v49  ;;  %v986_v21 = vmul.f32 %v2322_v39, %v985_v10  ;;  %v987_v43 = vmul.f32 %v2326_v50, %v985_v10 }
  0xe8   : > { %v982_v61 = vadd.f32 %v978_v30, %v972_v15  ;;  %v983_v9 = vadd.f32 %v979_v28, %v973_v4  ;;  %v988_v57 = vmul.f32 %v2330_v56, %v985_v10  ;;  %v989_v48 = vmul.f32 %v2339_v62, %v985_v10 }
  0xe9   : > { %v990_v52 = vadd.f32 %v986_v21, %v980_v35  ;;  %v995_v33 = vstv %s2554_s25  ;;  %v1005_v41 = vstv %s2556_s26  ;;  %v991_v6 = vadd.f32 %v987_v43, %v981_v1  ;;  %s2754_s25 = sld [smem:[#allocation2 + $0x7d]]  ;;  %s2760_s26 = sld [smem:[#allocation2 + $0x86]] }
  0xea   : > { %v992_v39 = vadd.f32 %v988_v57, %v982_v61  ;;  %v996_v12 = vmul.f32 %v2364_v27, %v995_v33  ;;  %v997_v13 = vmul.f32 %v2374_v53, %v995_v33  ;;  %v993_v14 = vadd.f32 %v989_v48, %v983_v9 }
  0xeb   : > { %v998_v50 = vmul.f32 %v2378_v58, %v995_v33  ;;  %v999_v56 = vmul.f32 %v2384_v8, %v995_v33  ;;  %v1006_v24 = vmul.f32 %v2414_v36, %v1005_v41  ;;  %v1007_v62 = vmul.f32 %v2420_v46, %v1005_v41 }
  0xec   : > { %v1000_v16 = vadd.f32 %v996_v12, %v990_v52  ;;  %v1001_v22 = vadd.f32 %v997_v13, %v991_v6  ;;  %v1008_v34 = vmul.f32 %v2423_v59, %v1005_v41  ;;  %v1009_v27 = vmul.f32 %v2432_v11, %v1005_v41 }
  0xed   : > { %v1002_v32 = vadd.f32 %v998_v50, %v992_v39  ;;  %v1003_v5 = vadd.f32 %v999_v56, %v993_v14  ;;  %v1020_v53 = vstv %s2570_s27  ;;  %v2598_v58 = vpop.eup %1669  ;;  %v1025_v2 = vstv %s2576_s28  ;;  %s2764_s27 = sld [smem:[#allocation2 + $0x7e]]  ;;  %s2766_s28 = sld [smem:[#allocation2 + $0x7f]] }
  0xee   : > { %v1010_v8 = vadd.f32 %v1006_v24, %v1000_v16  ;;  %v1011_v36 = vadd.f32 %v1007_v62, %v1001_v22  ;;  %v1021_v37 = vmul.f32 %v2468_v60, %v1020_v53  ;;  %v1022_v46 = vmul.f32 %v2470_v25, %v1020_v53  ;;  %v2602_v26 = vpop.eup %1671 }
  0xef   : > { %v1012_v59 = vadd.f32 %v1008_v34, %v1002_v32  ;;  %v1013_v20 = vadd.f32 %v1009_v27, %v1003_v5  ;;  %v1023_v40 = vmul.f32 %v2476_v29, %v1020_v53  ;;  %v1024_v11 = vmul.f32 %v2481_v55, %v1020_v53  ;;  %v2606_v31 = vpop.eup %1673 }
  0xf0   : > { %1677 = vtanh.f32 %v1010_v8  ;;  %v1031_v44 = vstv %s2580_s29  ;;  %v1041_v19 = vstv %s2582_s30  ;;  %v2615_v42 = vpop.eup %1675  ;;  %v1026_v23 = vadd.f32 %v1025_v2, %v1021_v37  ;;  %s2780_s29 = sld [smem:[#allocation2 + $0x80]]  ;;  %s2795_s30 = sld [smem:[#allocation2 + $0x81]] }
  0xf1   : > { %1679 = vtanh.f32 %v1011_v36  ;;  %v1027_v3 = vadd.f32 %v1025_v2, %v1022_v46  ;;  %v1028_v49 = vadd.f32 %v1025_v2, %v1023_v40  ;;  %v1029_v15 = vadd.f32 %v1025_v2, %v1024_v11 }
  0xf2   : > { %1681 = vtanh.f32 %v1012_v59  ;;  %v1032_v4 = vmul.f32 %v2506_v63, %v1031_v44  ;;  %v1033_v7 = vmul.f32 %v2510_v17, %v1031_v44  ;;  %v1034_v47 = vmul.f32 %v2514_v51, %v1031_v44 }
  0xf3   : > { %1683 = vtanh.f32 %v1013_v20  ;;  %v1035_v30 = vmul.f32 %v2523_v18, %v1031_v44  ;;  %v1042_v28 = vmul.f32 %v2548_v54, %v1041_v19  ;;  %v1043_v1 = vmul.f32 %v2558_v38, %v1041_v19 }
  0xf4   : > { %v1036_v10 = vadd.f32 %v1032_v4, %v1026_v23  ;;  %v1037_v35 = vadd.f32 %v1033_v7, %v1027_v3  ;;  %v1044_v21 = vmul.f32 %v2562_v0, %v1041_v19  ;;  %v1038_v61 = vadd.f32 %v1034_v47, %v1028_v49 }
  0xf5   : > { %v1039_v9 = vadd.f32 %v1035_v30, %v1029_v15  ;;  %v1045_v43 = vmul.f32 %v2566_v45, %v1041_v19  ;;  %v1051_v57 = vstv %s2596_s4  ;;  %v1061_v56 = vstv %s2611_s5  ;;  %s2797_s4 = sld [smem:[#allocation2 + $0x87]]  ;;  %s2808_s5 = sld [smem:[#allocation2 + $0x8c]] }
  0xf6   : > { %v1046_v48 = vadd.f32 %v1042_v28, %v1036_v10  ;;  %v1047_v52 = vadd.f32 %v1043_v1, %v1037_v35  ;;  %v1052_v33 = vmul.f32 %v2598_v58, %v1051_v57  ;;  %v1053_v41 = vmul.f32 %v2602_v26, %v1051_v57 }
  0xf7   : > { %v1048_v6 = vadd.f32 %v1044_v21, %v1038_v61  ;;  %v1049_v39 = vadd.f32 %v1045_v43, %v1039_v9  ;;  %v1054_v12 = vmul.f32 %v2606_v31, %v1051_v57  ;;  %v1055_v13 = vmul.f32 %v2615_v42, %v1051_v57 }
  0xf8   : > { %v1056_v14 = vadd.f32 %v1052_v33, %v1046_v48  ;;  %v1057_v50 = vadd.f32 %v1053_v41, %v1047_v52  ;;  %v1076_v24 = vstv %s2613_s6  ;;  %v1081_v53 = vstv %s2619_s7  ;;  %s2810_s6 = sld [smem:[#allocation2 + $0x88]]  ;;  %s2818_s7 = sld [smem:[#allocation2 + $0x89]] }
  0xf9   : > { %v1058_v16 = vadd.f32 %v1054_v12, %v1048_v6  ;;  %v1059_v22 = vadd.f32 %v1055_v13, %v1049_v39  ;;  %v1077_v62 = vmul.f32 %v2468_v60, %v1076_v24  ;;  %v1078_v34 = vmul.f32 %v2470_v25, %v1076_v24 }
  0xfa   : > { %v2642_v32 = vpop.eup %1677  ;;  %v1079_v5 = vmul.f32 %v2476_v29, %v1076_v24  ;;  %v1080_v27 = vmul.f32 %v2481_v55, %v1076_v24  ;;  %v1087_v8 = vstv %s2621_s8  ;;  %v1097_v61 = vstv %s2636_s9  ;;  %s2828_s8 = sld [smem:[#allocation2 + $0x8a]]  ;;  %s1514_s9 = sld [smem:[#allocation2 + $0x8b]] }
  0xfb   : > { %v2648_v36 = vpop.eup %1679  ;;  %v1062_v37 = vmul.f32 %v2642_v32, %v1061_v56  ;;  %v1082_v46 = vadd.f32 %v1081_v53, %v1077_v62  ;;  %v1083_v59 = vadd.f32 %v1081_v53, %v1078_v34  ;;  %v1088_v20 = vmul.f32 %v2506_v63, %v1087_v8 }
  0xfc   : > { %v2652_v40 = vpop.eup %1681  ;;  %v1063_v11 = vmul.f32 %v2648_v36, %v1061_v56  ;;  %v1084_v2 = vadd.f32 %v1081_v53, %v1079_v5  ;;  %v1085_v44 = vadd.f32 %v1081_v53, %v1080_v27  ;;  %v1089_v19 = vmul.f32 %v2510_v17, %v1087_v8 }
  0xfd   : > { %v2660_v23 = vpop.eup %1683  ;;  %v1064_v3 = vmul.f32 %v2652_v40, %v1061_v56  ;;  %v1066_v49 = vadd.f32 %v1062_v37, %v1056_v14  ;;  %v1090_v15 = vmul.f32 %v2514_v51, %v1087_v8  ;;  %v1091_v4 = vmul.f32 %v2523_v18, %v1087_v8 }
  0xfe   : > { %v1065_v7 = vmul.f32 %v2660_v23, %v1061_v56  ;;  %v1067_v47 = vadd.f32 %v1063_v11, %v1057_v50  ;;  %v1092_v30 = vadd.f32 %v1088_v20, %v1082_v46  ;;  %v1093_v28 = vadd.f32 %v1089_v19, %v1083_v59 }
  0xff   : > { %v1068_v10 = vadd.f32 %v1064_v3, %v1058_v16  ;;  %1685 = vtanh.f32 %v1066_v49  ;;  %v1094_v35 = vadd.f32 %v1090_v15, %v1084_v2  ;;  %v1095_v1 = vadd.f32 %v1091_v4, %v1085_v44 }
 0x100   : > { %v1069_v21 = vadd.f32 %v1065_v7, %v1059_v22  ;;  %1687 = vtanh.f32 %v1067_v47  ;;  %v1107_v9 = vstv %s2638_s10  ;;  %v1098_v43 = vmul.f32 %v2548_v54, %v1097_v61 }
 0x101   : > { %1689 = vtanh.f32 %v1068_v10  ;;  %v1099_v57 = vmul.f32 %v2558_v38, %v1097_v61  ;;  %v1100_v48 = vmul.f32 %v2562_v0, %v1097_v61  ;;  %v1101_v52 = vmul.f32 %v2566_v45, %v1097_v61 }
 0x102   : > { %1691 = vtanh.f32 %v1069_v21  ;;  %v1108_v33 = vmul.f32 %v2598_v58, %v1107_v9  ;;  %v1109_v41 = vmul.f32 %v2602_v26, %v1107_v9  ;;  %v1102_v6 = vadd.f32 %v1098_v43, %v1092_v30 }
 0x103   : > { %v1103_v39 = vadd.f32 %v1099_v57, %v1093_v28  ;;  %v1104_v12 = vadd.f32 %v1100_v48, %v1094_v35  ;;  %v1110_v13 = vmul.f32 %v2606_v31, %v1107_v9  ;;  %v1105_v14 = vadd.f32 %v1101_v52, %v1095_v1 }
 0x104   : > { %v1111_v50 = vmul.f32 %v2615_v42, %v1107_v9  ;;  %v1117_v56 = vstv %s2656_s11  ;;  %v1132_v24 = vstv %s2658_s12  ;;  %v1112_v16 = vadd.f32 %v1108_v33, %v1102_v6  ;;  %s1351_s12 = scalar_lea.vmem %s2854_s3, %s1779_s23 }
 0x105   : > { %v1113_v22 = vadd.f32 %v1109_v41, %v1103_v39  ;;  %v1114_v62 = vadd.f32 %v1110_v13, %v1104_v12  ;;  %v1118_v34 = vmul.f32 %v2642_v32, %v1117_v56  ;;  %v1119_v27 = vmul.f32 %v2648_v36, %v1117_v56 }
 0x106   : > { %v1115_v5 = vadd.f32 %v1111_v50, %v1105_v14  ;;  %v1120_v53 = vmul.f32 %v2652_v40, %v1117_v56  ;;  %v1121_v8 = vmul.f32 %v2660_v23, %v1117_v56  ;;  %v1133_v46 = vmul.f32 %v2468_v60, %v1132_v24 }
 0x107   : > { %v1122_v37 = vadd.f32 %v1118_v34, %v1112_v16  ;;  %v1134_v59 = vmul.f32 %v2470_v25, %v1132_v24  ;;  %v1135_v20 = vmul.f32 %v2476_v29, %v1132_v24  ;;  %v1123_v11 = vadd.f32 %v1119_v27, %v1113_v22 }
 0x108   : > { %v1124_v2 = vadd.f32 %v1120_v53, %v1114_v62  ;;  %v1125_v44 = vadd.f32 %v1121_v8, %v1115_v5  ;;  %v1136_v19 = vmul.f32 %v2481_v55, %v1132_v24  ;;  %v1137_v49 = vstv %s2668_s13 }
 0x109   : > { %v2694_v3 = vpop.eup %1685  ;;  %1693 = vtanh.f32 %v1122_v37  ;;  %v1143_v15 = vstv %s2673_s14  ;;  %v1153_v4 = vstv %s2675_s15  ;;  %v1138_v47 = vadd.f32 %v1137_v49, %v1133_v46 }
 0x10a   : > { %v2703_v7 = vpop.eup %1687  ;;  %1695 = vtanh.f32 %v1123_v11  ;;  %v1139_v30 = vadd.f32 %v1137_v49, %v1134_v59  ;;  %v1140_v28 = vadd.f32 %v1137_v49, %v1135_v20  ;;  %v1141_v35 = vadd.f32 %v1137_v49, %v1136_v19 }
 0x10b   : > { %v2705_v10 = vpop.eup %1689  ;;  %1697 = vtanh.f32 %v1124_v2  ;;  %v1144_v1 = vmul.f32 %v2506_v63, %v1143_v15  ;;  %v1145_v21 = vmul.f32 %v2510_v17, %v1143_v15  ;;  %v1146_v9 = vmul.f32 %v2514_v51, %v1143_v15 }
 0x10c   : > { %v2709_v61 = vpop.eup %1691  ;;  %1699 = vtanh.f32 %v1125_v44  ;;  %v1147_v43 = vmul.f32 %v2523_v18, %v1143_v15  ;;  %v1154_v57 = vmul.f32 %v2548_v54, %v1153_v4  ;;  %v1155_v33 = vmul.f32 %v2558_v38, %v1153_v4 }
 0x10d   : > { %v1148_v48 = vadd.f32 %v1144_v1, %v1138_v47  ;;  %v1149_v52 = vadd.f32 %v1145_v21, %v1139_v30  ;;  %v1156_v41 = vmul.f32 %v2562_v0, %v1153_v4  ;;  %v1150_v6 = vadd.f32 %v1146_v9, %v1140_v28 }
 0x10e   : > { %v1151_v39 = vadd.f32 %v1147_v43, %v1141_v35  ;;  %v1157_v12 = vmul.f32 %v2566_v45, %v1153_v4  ;;  %v1163_v13 = vstv %s2688_s16  ;;  %v1173_v53 = vstv %s2699_s0 }
 0x10f   : > { %v1158_v14 = vadd.f32 %v1154_v57, %v1148_v48  ;;  %v1159_v50 = vadd.f32 %v1155_v33, %v1149_v52  ;;  %v1164_v56 = vmul.f32 %v2598_v58, %v1163_v13  ;;  %v1165_v24 = vmul.f32 %v2602_v26, %v1163_v13 }
 0x110   : > { %v1160_v16 = vadd.f32 %v1156_v41, %v1150_v6  ;;  %v1161_v22 = vadd.f32 %v1157_v12, %v1151_v39  ;;  %v1166_v62 = vmul.f32 %v2606_v31, %v1163_v13  ;;  %v1167_v34 = vmul.f32 %v2615_v42, %v1163_v13 }
 0x111   : > { %v1168_v5 = vadd.f32 %v1164_v56, %v1158_v14  ;;  %v1169_v27 = vadd.f32 %v1165_v24, %v1159_v50  ;;  %v1188_v8 = vstv %s2701_s18  ;;  %v1174_v59 = vmul.f32 %v2642_v32, %v1173_v53 }
 0x112   : > { %v1170_v37 = vadd.f32 %v1166_v62, %v1160_v16  ;;  %v1171_v46 = vadd.f32 %v1167_v34, %v1161_v22  ;;  %v1175_v20 = vmul.f32 %v2648_v36, %v1173_v53  ;;  %v1176_v2 = vmul.f32 %v2652_v40, %v1173_v53 }
 0x113   : > { %v2732_v11 = vpop.eup %1693  ;;  %v1177_v44 = vmul.f32 %v2660_v23, %v1173_v53  ;;  %v1189_v19 = vmul.f32 %v2468_v60, %v1188_v8  ;;  %v1190_v49 = vmul.f32 %v2470_v25, %v1188_v8  ;;  %v1178_v4 = vadd.f32 %v1174_v59, %v1168_v5 }
 0x114   : > { %v2742_v15 = vpop.eup %1695  ;;  %v1179_v47 = vadd.f32 %v1175_v20, %v1169_v27  ;;  %v1191_v30 = vmul.f32 %v2476_v29, %v1188_v8  ;;  %v1192_v28 = vmul.f32 %v2481_v55, %v1188_v8  ;;  %v1180_v1 = vadd.f32 %v1176_v2, %v1170_v37 }
 0x115   : > { %v2746_v35 = vpop.eup %1697  ;;  %v1181_v21 = vadd.f32 %v1177_v44, %v1171_v46  ;;  %v1193_v9 = vstv %s2716_s19  ;;  %v1199_v43 = vstv %s2718_s20  ;;  %1701 = vtanh.f32 %v1178_v4 }
 0x116   : > { %v2750_v57 = vpop.eup %1699  ;;  %v1194_v48 = vadd.f32 %v1193_v9, %v1189_v19  ;;  %v1195_v52 = vadd.f32 %v1193_v9, %v1190_v49  ;;  %v1196_v33 = vadd.f32 %v1193_v9, %v1191_v30  ;;  %1703 = vtanh.f32 %v1179_v47 }
 0x117   : > { %v1197_v41 = vadd.f32 %v1193_v9, %v1192_v28  ;;  %v1200_v6 = vmul.f32 %v2506_v63, %v1199_v43  ;;  %v1201_v39 = vmul.f32 %v2510_v17, %v1199_v43  ;;  %1705 = vtanh.f32 %v1180_v1 }
 0x118   : > { %v1202_v12 = vmul.f32 %v2514_v51, %v1199_v43  ;;  %v1203_v13 = vmul.f32 %v2523_v18, %v1199_v43  ;;  %v1209_v14 = vstv %s2726_s21  ;;  %1707 = vtanh.f32 %v1181_v21 }
 0x119   : > { %v1204_v50 = vadd.f32 %v1200_v6, %v1194_v48  ;;  %v1205_v56 = vadd.f32 %v1201_v39, %v1195_v52  ;;  %v1210_v24 = vmul.f32 %v2548_v54, %v1209_v14  ;;  %v1211_v62 = vmul.f32 %v2558_v38, %v1209_v14 }
 0x11a   : > { %v1206_v16 = vadd.f32 %v1202_v12, %v1196_v33  ;;  %v1207_v22 = vadd.f32 %v1203_v13, %v1197_v41  ;;  %v1212_v34 = vmul.f32 %v2562_v0, %v1209_v14  ;;  %v1213_v5 = vmul.f32 %v2566_v45, %v1209_v14 }
 0x11b   : > { %v1214_v27 = vadd.f32 %v1210_v24, %v1204_v50  ;;  %v1219_v53 = vstv %s2738_s22  ;;  %v1229_v8 = vstv %s2740_s24  ;;  %v1215_v37 = vadd.f32 %v1211_v62, %v1205_v56 }
 0x11c   : > { %v1216_v46 = vadd.f32 %v1212_v34, %v1206_v16  ;;  %v1220_v59 = vmul.f32 %v2598_v58, %v1219_v53  ;;  %v1221_v20 = vmul.f32 %v2602_v26, %v1219_v53  ;;  %v1217_v2 = vadd.f32 %v1213_v5, %v1207_v22 }
 0x11d   : > { %v1222_v44 = vmul.f32 %v2606_v31, %v1219_v53  ;;  %v1223_v19 = vmul.f32 %v2615_v42, %v1219_v53  ;;  %v1230_v49 = vmul.f32 %v2642_v32, %v1229_v8  ;;  %v1231_v30 = vmul.f32 %v2648_v36, %v1229_v8 }
 0x11e   : > { %v1224_v4 = vadd.f32 %v1220_v59, %v1214_v27  ;;  %v1225_v47 = vadd.f32 %v1221_v20, %v1215_v37  ;;  %v1232_v28 = vmul.f32 %v2652_v40, %v1229_v8  ;;  %v1233_v9 = vmul.f32 %v2660_v23, %v1229_v8 }
 0x11f   : > { %v1226_v1 = vadd.f32 %v1222_v44, %v1216_v46  ;;  %v1227_v21 = vadd.f32 %v1223_v19, %v1217_v2  ;;  %v1244_v43 = vstv %s2754_s25  ;;  %v2782_v48 = vpop.eup %1701  ;;  %v1249_v24 = vstv %s2760_s26 }
 0x120   : > { %v1234_v52 = vadd.f32 %v1230_v49, %v1224_v4  ;;  %v1235_v33 = vadd.f32 %v1231_v30, %v1225_v47  ;;  %v1245_v41 = vmul.f32 %v2468_v60, %v1244_v43  ;;  %v1246_v6 = vmul.f32 %v2470_v25, %v1244_v43  ;;  %v2786_v39 = vpop.eup %1703 }
 0x121   : > { %v1236_v12 = vadd.f32 %v1232_v28, %v1226_v1  ;;  %v1237_v13 = vadd.f32 %v1233_v9, %v1227_v21  ;;  %v1247_v14 = vmul.f32 %v2476_v29, %v1244_v43  ;;  %v1248_v50 = vmul.f32 %v2481_v55, %v1244_v43  ;;  %v2790_v56 = vpop.eup %1705 }
 0x122   : > { %1709 = vtanh.f32 %v1234_v52  ;;  %v1255_v16 = vstv %s2764_s27  ;;  %v1265_v22 = vstv %s2766_s28  ;;  %v2799_v60 = vpop.eup %1707  ;;  %v1250_v25 = vadd.f32 %v1249_v24, %v1245_v41 }
 0x123   : > { %1711 = vtanh.f32 %v1235_v33  ;;  %v1251_v62 = vadd.f32 %v1249_v24, %v1246_v6  ;;  %v1252_v34 = vadd.f32 %v1249_v24, %v1247_v14  ;;  %v1253_v29 = vadd.f32 %v1249_v24, %v1248_v50 }
 0x124   : > { %1713 = vtanh.f32 %v1236_v12  ;;  %v1256_v55 = vmul.f32 %v2506_v63, %v1255_v16  ;;  %v1257_v5 = vmul.f32 %v2510_v17, %v1255_v16  ;;  %v1258_v27 = vmul.f32 %v2514_v51, %v1255_v16 }
 0x125   : > { %1715 = vtanh.f32 %v1237_v13  ;;  %v1259_v53 = vmul.f32 %v2523_v18, %v1255_v16  ;;  %v1266_v8 = vmul.f32 %v2548_v54, %v1265_v22  ;;  %v1267_v59 = vmul.f32 %v2558_v38, %v1265_v22 }
 0x126   : > { %v1260_v37 = vadd.f32 %v1256_v55, %v1250_v25  ;;  %v1261_v46 = vadd.f32 %v1257_v5, %v1251_v62  ;;  %v1268_v20 = vmul.f32 %v2562_v0, %v1265_v22  ;;  %v1262_v63 = vadd.f32 %v1258_v27, %v1252_v34 }
 0x127   : > { %v1263_v17 = vadd.f32 %v1259_v53, %v1253_v29  ;;  %v1269_v51 = vmul.f32 %v2566_v45, %v1265_v22  ;;  %v1275_v2 = vstv %s2780_s29  ;;  %v1285_v28 = vstv %s2795_s30 }
 0x128   : > { %v1270_v18 = vadd.f32 %v1266_v8, %v1260_v37  ;;  %v1271_v44 = vadd.f32 %v1267_v59, %v1261_v46  ;;  %v1276_v54 = vmul.f32 %v2598_v58, %v1275_v2  ;;  %v1277_v19 = vmul.f32 %v2602_v26, %v1275_v2 }
 0x129   : > { %v1272_v38 = vadd.f32 %v1268_v20, %v1262_v63  ;;  %v1273_v49 = vadd.f32 %v1269_v51, %v1263_v17  ;;  %v1278_v0 = vmul.f32 %v2606_v31, %v1275_v2  ;;  %v1279_v4 = vmul.f32 %v2615_v42, %v1275_v2 }
 0x12a   : > { %v1280_v47 = vadd.f32 %v1276_v54, %v1270_v18  ;;  %v1281_v30 = vadd.f32 %v1277_v19, %v1271_v44  ;;  %v1300_v1 = vstv %s2797_s4  ;;  %v1286_v9 = vmul.f32 %v2642_v32, %v1285_v28 }
 0x12b   : > { %v1282_v45 = vadd.f32 %v1278_v0, %v1272_v38  ;;  %v1283_v21 = vadd.f32 %v1279_v4, %v1273_v49  ;;  %v1287_v58 = vmul.f32 %v2648_v36, %v1285_v28  ;;  %v1288_v43 = vmul.f32 %v2652_v40, %v1285_v28 }
 0x12c   : > { %v1710_v26 = vpop.eup %1709  ;;  %v1289_v31 = vmul.f32 %v2660_v23, %v1285_v28  ;;  %v1301_v42 = vmul.f32 %v2694_v3, %v1300_v1  ;;  %v1302_v52 = vmul.f32 %v2703_v7, %v1300_v1  ;;  %v1290_v41 = vadd.f32 %v1286_v9, %v1280_v47 }
 0x12d   : > { %v1712_v33 = vpop.eup %1711  ;;  %v1291_v6 = vadd.f32 %v1287_v58, %v1281_v30  ;;  %v1303_v32 = vmul.f32 %v2705_v10, %v1300_v1  ;;  %v1304_v12 = vmul.f32 %v2709_v61, %v1300_v1  ;;  %v1292_v13 = vadd.f32 %v1288_v43, %v1282_v45 }
 0x12e   : > { %v1714_v36 = vpop.eup %1713  ;;  %v1293_v14 = vadd.f32 %v1289_v31, %v1283_v21  ;;  %v1305_v40 = vstv %s2808_s5  ;;  %v1311_v50 = vstv %s2810_s6  ;;  %1717 = vtanh.f32 %v1290_v41 }
 0x12f   : > { %v1716_v23 = vpop.eup %1715  ;;  %v1306_v3 = vadd.f32 %v1305_v40, %v1301_v42  ;;  %v1307_v24 = vadd.f32 %v1305_v40, %v1302_v52  ;;  %v1308_v7 = vadd.f32 %v1305_v40, %v1303_v32  ;;  %1719 = vtanh.f32 %v1291_v6 }
 0x130   : > { %v1309_v16 = vadd.f32 %v1305_v40, %v1304_v12  ;;  %v1312_v22 = vmul.f32 %v2732_v11, %v1311_v50  ;;  %v1313_v10 = vmul.f32 %v2742_v15, %v1311_v50  ;;  %1721 = vtanh.f32 %v1292_v13 }
 0x131   : > { %v1314_v61 = vmul.f32 %v2746_v35, %v1311_v50  ;;  %v1315_v25 = vmul.f32 %v2750_v57, %v1311_v50  ;;  %v1321_v62 = vstv %s2818_s7  ;;  %1723 = vtanh.f32 %v1293_v14 }
 0x132   : > { %v1316_v34 = vadd.f32 %v1312_v22, %v1306_v3  ;;  %v1317_v29 = vadd.f32 %v1313_v10, %v1307_v24  ;;  %v1322_v55 = vmul.f32 %v2782_v48, %v1321_v62  ;;  %v1323_v53 = vmul.f32 %v2786_v39, %v1321_v62 }
 0x133   : > { %v1318_v5 = vadd.f32 %v1314_v61, %v1308_v7  ;;  %v1319_v27 = vadd.f32 %v1315_v25, %v1309_v16  ;;  %v1324_v11 = vmul.f32 %v2790_v56, %v1321_v62  ;;  %v1325_v8 = vmul.f32 %v2799_v60, %v1321_v62 }
 0x134   : > { %v1326_v15 = vadd.f32 %v1322_v55, %v1316_v34  ;;  %v1331_v37 = vstv %s2828_s8  ;;  %v1327_v46 = vadd.f32 %v1323_v53, %v1317_v29  ;;  %v1341_v51 = vstv %s1514_s9 }
 0x135   : > { %v1332_v35 = vmul.f32 %v1710_v26, %v1331_v37  ;;  %v1333_v57 = vmul.f32 %v1712_v33, %v1331_v37  ;;  %v1328_v59 = vadd.f32 %v1324_v11, %v1318_v5  ;;  %v1334_v20 = vmul.f32 %v1714_v36, %v1331_v37 }
 0x136   : > { %v1329_v63 = vadd.f32 %v1325_v8, %v1319_v27  ;;  %v1335_v17 = vmul.f32 %v1716_v23, %v1331_v37 }
 0x137   : > { %v1336_v48 = vadd.f32 %v1332_v35, %v1326_v15  ;;  %v1337_v18 = vadd.f32 %v1333_v57, %v1327_v46  ;;  %v1338_v39 = vadd.f32 %v1334_v20, %v1328_v59 }
 0x138   : > { %v1718_v2 = vpop.eup %1717  ;;  %v1339_v19 = vadd.f32 %v1335_v17, %v1329_v63 }
 0x139   : > { %v1720_v44 = vpop.eup %1719  ;;  %v1342_v54 = vmul.f32 %v1718_v2, %v1341_v51 }
 0x13a   : > { %v1722_v56 = vpop.eup %1721  ;;  %v1343_v60 = vmul.f32 %v1720_v44, %v1341_v51  ;;  %31 = sbr.rel (!%p29_p5) target bundleno = 16 (0x10), region = 46 }
 0x13b   : > { %v1724_v38 = vpop.eup %1723  ;;  %v1344_v49 = vmul.f32 %v1722_v56, %v1341_v51  ;;  %v1346_v0 = vadd.f32 %v1342_v54, %v1336_v48 }
 0x13c   : > { %v1345_v4 = vmul.f32 %v1724_v38, %v1341_v51  ;;  %v1347_v47 = vadd.f32 %v1343_v60, %v1337_v18 }
 0x13d   : > { %v1348_v30 = vadd.f32 %v1344_v49, %v1338_v39  ;;  %1352 = vst [vmem:[%s1351_s12] sm:$0xff] %v1346_v0 }
 0x13e   : > { %v1349_v28 = vadd.f32 %v1345_v4, %v1339_v19  ;;  %1353 = vst [vmem:[%s1351_s12 + $0x8] sm:$0xff] %v1347_v47 }
 0x13f   : > { %1354 = vst [vmem:[%s1351_s12 + $0x10] sm:$0xff] %v1348_v30 }
 0x140   : > { %1355 = vst [vmem:[%s1351_s12 + $0x18] sm:$0xff] %v1349_v28 }
 0x141   :  { %1360 = vsyncpa [#allocation3], 1 }

</bundles_post_ra>
